<compile_context>
chip_gen: v7x
topology: tpu7x:2x2x1
jax: 0.10.0
libtpu: 0.0.40
codegen_flags: <defaults>
</compile_context>

<pallas_src>
import functools

import jax
import jax.numpy as jnp
from jax.experimental import pallas as pl
from jax.experimental.pallas import tpu as pltpu

# VICReg coefficients (PyTorch defaults l=25, mu=25, nu=1)
L_COEF = 25.0
MU_COEF = 25.0
NU_COEF = 1.0
_EPS = 1e-4

# Number of row-tile streams (leading "parallel" grid axis).  2 uses both
# TensorCores on v7x; harmless (serialized) on single-core v5e/v6e.
NUM_CORES = 2

# dot_general dimension_numbers: contract dim 0 of both (TILE_N, D) operands,
# i.e. z^T z without an explicit transpose.  TILE_N is the MXU K dimension.
_CONTRACT_ROWS = (((0,), (0,)), ((), ()))


def _vicreg_moments_kernel(z1_ref, z2_ref, mom_ref, g1_ref, g2_ref, *,
                           n_rows, tile_n, tiles_per_core, need_mask,
                           matmul_dtype):
    c = pl.program_id(0)   # core / stream index      ("parallel")
    t = pl.program_id(1)   # row-tile within a stream ("arbitrary")

    @pl.when(t == 0)
    def _init():
        mom_ref[...] = jnp.zeros_like(mom_ref)
        g1_ref[...] = jnp.zeros_like(g1_ref)
        g2_ref[...] = jnp.zeros_like(g2_ref)

    z1 = z1_ref[...]                      # native input dtype, (tile_n, D)
    z2 = z2_ref[...]
    if need_mask:
        # Ragged last tile and/or phantom tiles (clamped index re-reads the
        # last real block): zero out rows past the true batch size.
        row_start = (c * tiles_per_core + t) * tile_n
        rows = jax.lax.broadcasted_iota(jnp.int32, z1.shape, 0)
        valid = (rows + row_start) < n_rows
        z1 = jnp.where(valid, z1, jnp.zeros_like(z1))
        z2 = jnp.where(valid, z2, jnp.zeros_like(z2))
    z1 = z1.astype(jnp.float32)
    z2 = z2.astype(jnp.float32)

    # ---- exact f32 first/second per-column moments + invariance SSE ----
    diff = z1 - z2
    mom_ref[0, 0:1, :] += jnp.sum(z1, axis=0, keepdims=True)        # sum z1
    mom_ref[0, 1:2, :] += jnp.sum(z1 * z1, axis=0, keepdims=True)   # sum z1^2
    mom_ref[0, 2:3, :] += jnp.sum(z2, axis=0, keepdims=True)        # sum z2
    mom_ref[0, 3:4, :] += jnp.sum(z2 * z2, axis=0, keepdims=True)   # sum z2^2
    mom_ref[0, 4:5, :] += jnp.sum(diff * diff, axis=0, keepdims=True)

    # ---- raw cross-moment z^T z on the MXU (bf16 by default), f32 acc ----
    z1m = z1.astype(matmul_dtype)
    z2m = z2.astype(matmul_dtype)
    g1_ref[0] += jax.lax.dot_general(z1m, z1m, _CONTRACT_ROWS,
                                     preferred_element_type=jnp.float32)
    g2_ref[0] += jax.lax.dot_general(z2m, z2m, _CONTRACT_ROWS,
                                     preferred_element_type=jnp.float32)


def _vmem_capacity_bytes():
    try:
        return int(pltpu.get_tpu_info().vmem_capacity_bytes)
    except Exception:
        return 64 * 1024 * 1024   # conservative fallback (v7x per-core VMEM)


def _choose_tile_n(n, d, in_itemsize, vmem_budget_bytes):
    # Resident per-core accumulators: two (D, D) f32 Gram outputs + (8, D)
    # moment rows + slack for Mosaic internals.
    fixed = 2 * d * d * 4 + 8 * d * 4 + (2 << 20)
    # Streaming bytes per row: 2 views x 2 pipeline buffers in the native
    # input dtype + ~3 f32 working copies (casts / diff / squares) in flight.
    per_row = d * (4 * in_itemsize + 3 * 4)
    avail = vmem_budget_bytes - fixed
    if avail < 16 * per_row:
        # TODO(synk): huge-D regime needs column-tiled Gram accumulators.
        raise ValueError(
            f"feature dim D={d} too large for (D, D) Gram accumulators within "
            f"VMEM budget of {vmem_budget_bytes} bytes")
    rows = min(avail // per_row, 2048)       # >2048 rows: diminishing returns
    if rows >= n:
        return n                             # single full row-tile per stream
    return max(16, (int(rows) // 16) * 16)   # MXU K dim; bf16-friendly


def _finalize(mom, g1, g2, n, d):
    """Tiny O(D^2) combine of the per-core raw moments (plain JAX)."""
    mom = jnp.sum(mom, axis=0)               # (8, D)
    g1 = jnp.sum(g1, axis=0)                 # (D, D)
    g2 = jnp.sum(g2, axis=0)
    nf = float(n)
    df = float(d)

    sim = jnp.sum(mom[4]) / (nf * df)        # MSE over all elements

    def view_terms(s, q, g):
        mean = s / nf
        var_raw = q - nf * mean * mean                  # (N-1) * var, exact f32
        std = jnp.sqrt(var_raw / (nf - 1.0) + _EPS)
        std_term = jnp.mean(jnp.maximum(1.0 - std, 0.0))
        # ||G - n m m^T||_F^2 without materializing the covariance:
        frob2 = jnp.sum(g * g)
        mGm = jnp.dot(mean, jnp.dot(g, mean))
        m2 = jnp.sum(mean * mean)
        full2 = frob2 - 2.0 * nf * mGm + (nf * m2) ** 2
        # Diagonal correction from diag(G) so it matches the (possibly bf16)
        # Gram rounding (review correctness note).
        diag_raw = jnp.diagonal(g) - nf * mean * mean
        off2 = full2 - jnp.sum(diag_raw * diag_raw)
        return std_term, off2

    std1, off1 = view_terms(mom[0], mom[1], g1)
    std2, off2 = view_terms(mom[2], mom[3], g2)

    std_loss = std1 + std2
    cov_loss = (off1 + off2) / ((nf - 1.0) ** 2 * df)
    return L_COEF * sim + MU_COEF * std_loss + NU_COEF * cov_loss


def vicreg_loss(z1, z2, *, matmul_dtype=jnp.bfloat16, tile_n=None):
    assert z1.shape == z2.shape and z1.ndim == 2
    n, d = z1.shape
    assert n >= 2, "VICReg variance/covariance need at least 2 samples"

    in_itemsize = max(jnp.dtype(z1.dtype).itemsize, jnp.dtype(z2.dtype).itemsize)
    vmem_cap = _vmem_capacity_bytes()
    if tile_n is None:
        tile_n = _choose_tile_n(n, d, in_itemsize, (vmem_cap * 3) // 4)
    else:
        tile_n = int(tile_n)
        tile_n = n if tile_n >= n else max(8, (tile_n // 8) * 8)

    tiles_real = (n + tile_n - 1) // tile_n
    tiles_per_core = (tiles_real + NUM_CORES - 1) // NUM_CORES
    tiles_padded = tiles_per_core * NUM_CORES
    need_mask = (tiles_padded * tile_n) != n

    kernel = functools.partial(
        _vicreg_moments_kernel, n_rows=n, tile_n=tile_n,
        tiles_per_core=tiles_per_core, need_mask=need_mask,
        matmul_dtype=matmul_dtype)

    def in_map(c, t):
        # Clamp phantom tiles (only exist when tiles don't split evenly);
        # their rows are fully masked inside the kernel.
        return (jnp.minimum(c * tiles_per_core + t, tiles_real - 1), 0)

    def out_map(c, t):
        return (c, 0, 0)

    # Explicit, generation-aware VMEM limit (never above physical capacity).
    vmem_need = (2 * d * d * 4 + 8 * d * 4
                 + 4 * tile_n * d * in_itemsize      # 2 views x 2 buffers
                 + 3 * tile_n * d * 4)               # f32 working copies
    vmem_limit = int(min(vmem_cap, max(vmem_need * 3 // 2 + (4 << 20), 32 << 20)))

    mom, g1, g2 = pl.pallas_call(
        kernel,
        out_shape=(
            jax.ShapeDtypeStruct((NUM_CORES, 8, d), jnp.float32),   # s1,q1,s2,q2,sse
            jax.ShapeDtypeStruct((NUM_CORES, d, d), jnp.float32),   # sum z1^T z1
            jax.ShapeDtypeStruct((NUM_CORES, d, d), jnp.float32),   # sum z2^T z2
        ),
        grid_spec=pltpu.PrefetchScalarGridSpec(
            num_scalar_prefetch=0,
            grid=(NUM_CORES, tiles_per_core),
            in_specs=[pl.BlockSpec((tile_n, d), in_map),
                      pl.BlockSpec((tile_n, d), in_map)],
            out_specs=[pl.BlockSpec((1, 8, d), out_map),
                       pl.BlockSpec((1, d, d), out_map),
                       pl.BlockSpec((1, d, d), out_map)],
        ),
        compiler_params=pltpu.CompilerParams(
            dimension_semantics=("parallel", "arbitrary"),
            vmem_limit_bytes=vmem_limit),
    )(z1, z2)

    return _finalize(mom, g1, g2, n, d)


def _vicreg_loss_ref(z1, z2):
    """Pure-JAX reference mirroring the PyTorch module."""
    n, d = z1.shape
    sim = jnp.mean((z1 - z2) ** 2)

    def std_term(z):
        std = jnp.sqrt(jnp.var(z, axis=0, ddof=1) + _EPS)
        return jnp.mean(jnp.maximum(1.0 - std, 0.0))

    def cov_off(z):
        zc = z - jnp.mean(z, axis=0, keepdims=True)
        cov = zc.T @ zc / (n - 1)
        off = cov - jnp.diag(jnp.diag(cov))
        return jnp.sum(off ** 2)

    std_loss = std_term(z1) + std_term(z2)
    cov_loss = cov_off(z1) / d + cov_off(z2) / d
    return L_COEF * sim + MU_COEF * std_loss + NU_COEF * cov_loss


if __name__ == "__main__":
    key = jax.random.PRNGKey(0)
    k1, k2 = jax.random.split(key)
    # Small embeddings; D deliberately not a multiple of 128 (full-dim lane
    # block, no wrapper padding), N not a multiple of the forced tile below
    # (exercises the in-kernel ragged row mask + multi-tile accumulation).
    N, D = 200, 96
    z1 = jax.random.normal(k1, (N, D), dtype=jnp.float32)
    z2 = z1 + 0.1 * jax.random.normal(k2, (N, D), dtype=jnp.float32)

    ref = jax.block_until_ready(_vicreg_loss_ref(z1, z2))

    # Default path: auto row tile, bf16 Gram on the MXU (f32 accumulation).
    loss_bf16 = jax.block_until_ready(vicreg_loss(z1, z2))
    assert jnp.isfinite(loss_bf16), "non-finite loss (bf16 Gram path)"
    assert jnp.allclose(loss_bf16, ref, rtol=2e-2, atol=2e-2), (loss_bf16, ref)

    # f32 Gram + forced multi-tile streaming (ragged last tile, both streams).
    loss_f32 = jax.block_until_ready(
        vicreg_loss(z1, z2, matmul_dtype=jnp.float32, tile_n=64))
    assert jnp.isfinite(loss_f32), "non-finite loss (f32 Gram path)"
    assert jnp.allclose(loss_f32, ref, rtol=1e-4, atol=1e-4), (loss_f32, ref)

    # Native bf16 activations stream through unmodified (no wrapper pad/cast).
    z1b, z2b = z1.astype(jnp.bfloat16), z2.astype(jnp.bfloat16)
    ref_b = jax.block_until_ready(
        _vicreg_loss_ref(z1b.astype(jnp.float32), z2b.astype(jnp.float32)))
    loss_b = jax.block_until_ready(vicreg_loss(z1b, z2b, tile_n=64))
    assert jnp.isfinite(loss_b), "non-finite loss (bf16 input path)"
    assert jnp.allclose(loss_b, ref_b, rtol=2e-2, atol=2e-2), (loss_b, ref_b)

    print("KERNEL_OK")
</pallas_src>

<mosaic_0001>
module attributes {stable_mosaic.version = 11 : i64} {
  func.func @_vicreg_moments_kernel(%arg0: i32, %arg1: i32, %arg2: memref<200x96xf32, #tpu.memory_space<vmem>>, %arg3: memref<200x96xf32, #tpu.memory_space<vmem>>, %arg4: memref<1x8x96xf32, #tpu.memory_space<vmem>>, %arg5: memref<1x96x96xf32, #tpu.memory_space<vmem>>, %arg6: memref<1x96x96xf32, #tpu.memory_space<vmem>>) attributes {dimension_semantics = [#tpu.dimension_semantics<parallel>, #tpu.dimension_semantics<arbitrary>], iteration_bounds = array<i64: 2, 1>, scalar_prefetch = 0 : i64, scratch_operands = 0 : i64, tpu.core_type = #tpu.core_type<tc>, window_params = [{transform_indices = @transform_0, window_bounds = array<i64: 200, 96>}, {transform_indices = @transform_1, window_bounds = array<i64: 200, 96>}, {transform_indices = @transform_2, window_bounds = array<i64: 1, 8, 96>}, {transform_indices = @transform_3, window_bounds = array<i64: 1, 96, 96>}, {transform_indices = @transform_4, window_bounds = array<i64: 1, 96, 96>}]} {
    %c0_i32 = arith.constant 0 : i32
    %0 = arith.cmpi eq, %arg1, %c0_i32 : i32
    %1 = arith.extui %0 : i1 to i32
    %c0_i32_0 = arith.constant 0 : i32
    %2 = arith.cmpi ne, %1, %c0_i32_0 : i32
    scf.if %2 {
      %cst_51 = arith.constant 0.000000e+00 : f32
      %77 = vector.broadcast %cst_51 : f32 to vector<1x8x96xf32>
      %c0_52 = arith.constant 0 : index
      %c0_53 = arith.constant 0 : index
      %c0_54 = arith.constant 0 : index
      %78 = vector.load %arg4[%c0_52, %c0_53, %c0_54] : memref<1x8x96xf32, #tpu.memory_space<vmem>>, vector<1x8x96xf32>
      tpu.vector_store %arg4[%c0_52, %c0_53, %c0_54], %77 {strides = array<i32>} : memref<1x8x96xf32, #tpu.memory_space<vmem>>, vector<1x8x96xf32>,
      %cst_55 = arith.constant 0.000000e+00 : f32
      %79 = vector.broadcast %cst_55 : f32 to vector<1x96x96xf32>
      %c0_56 = arith.constant 0 : index
      %c0_57 = arith.constant 0 : index
      %c0_58 = arith.constant 0 : index
      %80 = vector.load %arg5[%c0_56, %c0_57, %c0_58] : memref<1x96x96xf32, #tpu.memory_space<vmem>>, vector<1x96x96xf32>
      tpu.vector_store %arg5[%c0_56, %c0_57, %c0_58], %79 {strides = array<i32>} : memref<1x96x96xf32, #tpu.memory_space<vmem>>, vector<1x96x96xf32>,
      %cst_59 = arith.constant 0.000000e+00 : f32
      %81 = vector.broadcast %cst_59 : f32 to vector<1x96x96xf32>
      %c0_60 = arith.constant 0 : index
      %c0_61 = arith.constant 0 : index
      %c0_62 = arith.constant 0 : index
      %82 = vector.load %arg6[%c0_60, %c0_61, %c0_62] : memref<1x96x96xf32, #tpu.memory_space<vmem>>, vector<1x96x96xf32>
      tpu.vector_store %arg6[%c0_60, %c0_61, %c0_62], %81 {strides = array<i32>} : memref<1x96x96xf32, #tpu.memory_space<vmem>>, vector<1x96x96xf32>,
    } else {
    }
    %c0 = arith.constant 0 : index
    %c0_1 = arith.constant 0 : index
    %3 = vector.load %arg2[%c0, %c0_1] : memref<200x96xf32, #tpu.memory_space<vmem>>, vector<200x96xf32>
    %c0_2 = arith.constant 0 : index
    %c0_3 = arith.constant 0 : index
    %4 = vector.load %arg3[%c0_2, %c0_3] : memref<200x96xf32, #tpu.memory_space<vmem>>, vector<200x96xf32>
    %c1_i32 = arith.constant 1 : i32
    %5 = arith.muli %arg0, %c1_i32 : i32
    %6 = arith.addi %5, %arg1 : i32
    %c200_i32 = arith.constant 200 : i32
    %7 = arith.muli %6, %c200_i32 : i32
    %8 = tpu.iota {dimensions = array<i32: 0>} : vector<200x96xi32>
    %9 = vector.broadcast %7 : i32 to vector<200x96xi32>
    %10 = arith.addi %8, %9 : vector<200x96xi32>
    %c200_i32_4 = arith.constant 200 : i32
    %11 = vector.broadcast %c200_i32_4 : i32 to vector<200x96xi32>
    %12 = arith.cmpi slt, %10, %11 : vector<200x96xi32>
    %cst = arith.constant 0.000000e+00 : f32
    %13 = vector.broadcast %cst : f32 to vector<200x96xf32>
    %14 = arith.select %12, %3, %13 : vector<200x96xi1>, vector<200x96xf32>
    %cst_5 = arith.constant 0.000000e+00 : f32
    %15 = vector.broadcast %cst_5 : f32 to vector<200x96xf32>
    %16 = arith.select %12, %4, %15 : vector<200x96xi1>, vector<200x96xf32>
    %17 = arith.subf %14, %16 : vector<200x96xf32>
    %c0_6 = arith.constant 0 : index
    %c0_7 = arith.constant 0 : index
    %c0_8 = arith.constant 0 : index
    %18 = vector.load %arg4[%c0_6, %c0_7, %c0_8] : memref<1x8x96xf32, #tpu.memory_space<vmem>>, vector<1x1x96xf32>
    %19 = vector.shape_cast %18 : vector<1x1x96xf32> to vector<1x96xf32>
    %cst_9 = arith.constant dense<0.000000e+00> : vector<96xf32>
    %20 = vector.multi_reduction <add>, %14, %cst_9 [0] : vector<200x96xf32> to vector<96xf32>
    %21 = vector.shape_cast %20 : vector<96xf32> to vector<1x96xf32>
    %22 = arith.addf %19, %21 : vector<1x96xf32>
    %c0_10 = arith.constant 0 : index
    %c0_11 = arith.constant 0 : index
    %c0_12 = arith.constant 0 : index
    %23 = vector.load %arg4[%c0_10, %c0_11, %c0_12] : memref<1x8x96xf32, #tpu.memory_space<vmem>>, vector<1x1x96xf32>
    %24 = vector.shape_cast %23 : vector<1x1x96xf32> to vector<1x96xf32>
    %25 = vector.shape_cast %22 : vector<1x96xf32> to vector<1x1x96xf32>
    tpu.vector_store %arg4[%c0_10, %c0_11, %c0_12], %25 {strides = array<i32>} : memref<1x8x96xf32, #tpu.memory_space<vmem>>, vector<1x1x96xf32>,
    %c0_13 = arith.constant 0 : index
    %c1 = arith.constant 1 : index
    %c0_14 = arith.constant 0 : index
    %26 = vector.load %arg4[%c0_13, %c1, %c0_14] : memref<1x8x96xf32, #tpu.memory_space<vmem>>, vector<1x1x96xf32>
    %27 = vector.shape_cast %26 : vector<1x1x96xf32> to vector<1x96xf32>
    %28 = arith.mulf %14, %14 : vector<200x96xf32>
    %cst_15 = arith.constant dense<0.000000e+00> : vector<96xf32>
    %29 = vector.multi_reduction <add>, %28, %cst_15 [0] : vector<200x96xf32> to vector<96xf32>
    %30 = vector.shape_cast %29 : vector<96xf32> to vector<1x96xf32>
    %31 = arith.addf %27, %30 : vector<1x96xf32>
    %c0_16 = arith.constant 0 : index
    %c1_17 = arith.constant 1 : index
    %c0_18 = arith.constant 0 : index
    %32 = vector.load %arg4[%c0_16, %c1_17, %c0_18] : memref<1x8x96xf32, #tpu.memory_space<vmem>>, vector<1x1x96xf32>
    %33 = vector.shape_cast %32 : vector<1x1x96xf32> to vector<1x96xf32>
    %34 = vector.shape_cast %31 : vector<1x96xf32> to vector<1x1x96xf32>
    tpu.vector_store %arg4[%c0_16, %c1_17, %c0_18], %34 {strides = array<i32>} : memref<1x8x96xf32, #tpu.memory_space<vmem>>, vector<1x1x96xf32>,
    %c0_19 = arith.constant 0 : index
    %c2 = arith.constant 2 : index
    %c0_20 = arith.constant 0 : index
    %35 = vector.load %arg4[%c0_19, %c2, %c0_20] : memref<1x8x96xf32, #tpu.memory_space<vmem>>, vector<1x1x96xf32>
    %36 = vector.shape_cast %35 : vector<1x1x96xf32> to vector<1x96xf32>
    %cst_21 = arith.constant dense<0.000000e+00> : vector<96xf32>
    %37 = vector.multi_reduction <add>, %16, %cst_21 [0] : vector<200x96xf32> to vector<96xf32>
    %38 = vector.shape_cast %37 : vector<96xf32> to vector<1x96xf32>
    %39 = arith.addf %36, %38 : vector<1x96xf32>
    %c0_22 = arith.constant 0 : index
    %c2_23 = arith.constant 2 : index
    %c0_24 = arith.constant 0 : index
    %40 = vector.load %arg4[%c0_22, %c2_23, %c0_24] : memref<1x8x96xf32, #tpu.memory_space<vmem>>, vector<1x1x96xf32>
    %41 = vector.shape_cast %40 : vector<1x1x96xf32> to vector<1x96xf32>
    %42 = vector.shape_cast %39 : vector<1x96xf32> to vector<1x1x96xf32>
    tpu.vector_store %arg4[%c0_22, %c2_23, %c0_24], %42 {strides = array<i32>} : memref<1x8x96xf32, #tpu.memory_space<vmem>>, vector<1x1x96xf32>,
    %c0_25 = arith.constant 0 : index
    %c3 = arith.constant 3 : index
    %c0_26 = arith.constant 0 : index
    %43 = vector.load %arg4[%c0_25, %c3, %c0_26] : memref<1x8x96xf32, #tpu.memory_space<vmem>>, vector<1x1x96xf32>
    %44 = vector.shape_cast %43 : vector<1x1x96xf32> to vector<1x96xf32>
    %45 = arith.mulf %16, %16 : vector<200x96xf32>
    %cst_27 = arith.constant dense<0.000000e+00> : vector<96xf32>
    %46 = vector.multi_reduction <add>, %45, %cst_27 [0] : vector<200x96xf32> to vector<96xf32>
    %47 = vector.shape_cast %46 : vector<96xf32> to vector<1x96xf32>
    %48 = arith.addf %44, %47 : vector<1x96xf32>
    %c0_28 = arith.constant 0 : index
    %c3_29 = arith.constant 3 : index
    %c0_30 = arith.constant 0 : index
    %49 = vector.load %arg4[%c0_28, %c3_29, %c0_30] : memref<1x8x96xf32, #tpu.memory_space<vmem>>, vector<1x1x96xf32>
    %50 = vector.shape_cast %49 : vector<1x1x96xf32> to vector<1x96xf32>
    %51 = vector.shape_cast %48 : vector<1x96xf32> to vector<1x1x96xf32>
    tpu.vector_store %arg4[%c0_28, %c3_29, %c0_30], %51 {strides = array<i32>} : memref<1x8x96xf32, #tpu.memory_space<vmem>>, vector<1x1x96xf32>,
    %c0_31 = arith.constant 0 : index
    %c4 = arith.constant 4 : index
    %c0_32 = arith.constant 0 : index
    %52 = vector.load %arg4[%c0_31, %c4, %c0_32] : memref<1x8x96xf32, #tpu.memory_space<vmem>>, vector<1x1x96xf32>
    %53 = vector.shape_cast %52 : vector<1x1x96xf32> to vector<1x96xf32>
    %54 = arith.mulf %17, %17 : vector<200x96xf32>
    %cst_33 = arith.constant dense<0.000000e+00> : vector<96xf32>
    %55 = vector.multi_reduction <add>, %54, %cst_33 [0] : vector<200x96xf32> to vector<96xf32>
    %56 = vector.shape_cast %55 : vector<96xf32> to vector<1x96xf32>
    %57 = arith.addf %53, %56 : vector<1x96xf32>
    %c0_34 = arith.constant 0 : index
    %c4_35 = arith.constant 4 : index
    %c0_36 = arith.constant 0 : index
    %58 = vector.load %arg4[%c0_34, %c4_35, %c0_36] : memref<1x8x96xf32, #tpu.memory_space<vmem>>, vector<1x1x96xf32>
    %59 = vector.shape_cast %58 : vector<1x1x96xf32> to vector<1x96xf32>
    %60 = vector.shape_cast %57 : vector<1x96xf32> to vector<1x1x96xf32>
    tpu.vector_store %arg4[%c0_34, %c4_35, %c0_36], %60 {strides = array<i32>} : memref<1x8x96xf32, #tpu.memory_space<vmem>>, vector<1x1x96xf32>,
    %61 = arith.truncf %14 : vector<200x96xf32> to vector<200x96xbf16>
    %62 = arith.truncf %16 : vector<200x96xf32> to vector<200x96xbf16>
    %c0_37 = arith.constant 0 : index
    %c0_38 = arith.constant 0 : index
    %c0_39 = arith.constant 0 : index
    %63 = vector.load %arg5[%c0_37, %c0_38, %c0_39] : memref<1x96x96xf32, #tpu.memory_space<vmem>>, vector<1x96x96xf32>
    %64 = vector.shape_cast %63 : vector<1x96x96xf32> to vector<96x96xf32>
    %cst_40 = arith.constant dense<0.000000e+00> : vector<96x96xf32>
    %65 = tpu.matmul %61, %61, %cst_40 {dimension_numbers = #tpu.dot_dimension_numbers<[0], [0], [1], [1], [0, 1, 1, 1], [], []>} : vector<200x96xbf16>, vector<200x96xbf16>, vector<96x96xf32> -> vector<96x96xf32>
    %66 = arith.addf %64, %65 : vector<96x96xf32>
    %c0_41 = arith.constant 0 : index
    %c0_42 = arith.constant 0 : index
    %c0_43 = arith.constant 0 : index
    %67 = vector.load %arg5[%c0_41, %c0_42, %c0_43] : memref<1x96x96xf32, #tpu.memory_space<vmem>>, vector<1x96x96xf32>
    %68 = vector.shape_cast %67 : vector<1x96x96xf32> to vector<96x96xf32>
    %69 = vector.shape_cast %66 : vector<96x96xf32> to vector<1x96x96xf32>
    tpu.vector_store %arg5[%c0_41, %c0_42, %c0_43], %69 {strides = array<i32>} : memref<1x96x96xf32, #tpu.memory_space<vmem>>, vector<1x96x96xf32>,
    %c0_44 = arith.constant 0 : index
    %c0_45 = arith.constant 0 : index
    %c0_46 = arith.constant 0 : index
    %70 = vector.load %arg6[%c0_44, %c0_45, %c0_46] : memref<1x96x96xf32, #tpu.memory_space<vmem>>, vector<1x96x96xf32>
    %71 = vector.shape_cast %70 : vector<1x96x96xf32> to vector<96x96xf32>
    %cst_47 = arith.constant dense<0.000000e+00> : vector<96x96xf32>
    %72 = tpu.matmul %62, %62, %cst_47 {dimension_numbers = #tpu.dot_dimension_numbers<[0], [0], [1], [1], [0, 1, 1, 1], [], []>} : vector<200x96xbf16>, vector<200x96xbf16>, vector<96x96xf32> -> vector<96x96xf32>
    %73 = arith.addf %71, %72 : vector<96x96xf32>
    %c0_48 = arith.constant 0 : index
    %c0_49 = arith.constant 0 : index
    %c0_50 = arith.constant 0 : index
    %74 = vector.load %arg6[%c0_48, %c0_49, %c0_50] : memref<1x96x96xf32, #tpu.memory_space<vmem>>, vector<1x96x96xf32>
    %75 = vector.shape_cast %74 : vector<1x96x96xf32> to vector<96x96xf32>
    %76 = vector.shape_cast %73 : vector<96x96xf32> to vector<1x96x96xf32>
    tpu.vector_store %arg6[%c0_48, %c0_49, %c0_50], %76 {strides = array<i32>} : memref<1x96x96xf32, #tpu.memory_space<vmem>>, vector<1x96x96xf32>,
    return
  }
  func.func @transform_0(%arg0: i32, %arg1: i32) -> (i32, i32) {
    %c1_i32 = arith.constant 1 : i32
    %0 = arith.muli %arg0, %c1_i32 : i32
    %1 = arith.addi %0, %arg1 : i32
    %c0_i32 = arith.constant 0 : i32
    %2 = arith.minsi %1, %c0_i32 : i32
    %c0_i32_0 = arith.constant 0 : i32
    %c0_i32_1 = arith.constant 0 : i32
    return %2, %c0_i32_0 : i32, i32
  }
  func.func @transform_1(%arg0: i32, %arg1: i32) -> (i32, i32) {
    %c1_i32 = arith.constant 1 : i32
    %0 = arith.muli %arg0, %c1_i32 : i32
    %1 = arith.addi %0, %arg1 : i32
    %c0_i32 = arith.constant 0 : i32
    %2 = arith.minsi %1, %c0_i32 : i32
    %c0_i32_0 = arith.constant 0 : i32
    %c0_i32_1 = arith.constant 0 : i32
    return %2, %c0_i32_0 : i32, i32
  }
  func.func @transform_2(%arg0: i32, %arg1: i32) -> (i32, i32, i32) {
    %c0_i32 = arith.constant 0 : i32
    %c0_i32_0 = arith.constant 0 : i32
    %c0_i32_1 = arith.constant 0 : i32
    return %arg0, %c0_i32, %c0_i32_0 : i32, i32, i32
  }
  func.func @transform_3(%arg0: i32, %arg1: i32) -> (i32, i32, i32) {
    %c0_i32 = arith.constant 0 : i32
    %c0_i32_0 = arith.constant 0 : i32
    %c0_i32_1 = arith.constant 0 : i32
    return %arg0, %c0_i32, %c0_i32_0 : i32, i32, i32
  }
  func.func @transform_4(%arg0: i32, %arg1: i32) -> (i32, i32, i32) {
    %c0_i32 = arith.constant 0 : i32
    %c0_i32_0 = arith.constant 0 : i32
    %c0_i32_1 = arith.constant 0 : i32
    return %arg0, %c0_i32, %c0_i32_0 : i32, i32, i32
  }
}

</mosaic_0001>

<bundles_post_ra>
// kernel: tpu_custom_call.1
= control target key start
LH: loop header
LB: loop body
LE: loop exit
PB: predicated region body
PF: predicated region fallthrough
CT: control target
= control target key end

     0   :  { %10 = vsyncpa [#allocation3], 0  ;;  %s3315_s0 = inlined_call_operand.vmem [shape: f32[200,96], index: 0, kind: input, shape index: {}]   ;;  %s3316_s1 = inlined_call_operand.vmem [shape: f32[200,96], index: 1, kind: input, shape index: {}]   ;;  %s3317_s2 = inlined_call_operand.hbm [shape: f32[2,8,96], index: 2, kind: output, shape index: {0}]   ;;  %s3318_s3 = inlined_call_operand.hbm [shape: f32[2,96,96], index: 3, kind: output, shape index: {1}]   ;;  %s3319_s4 = inlined_call_operand.hbm [shape: f32[2,96,96], index: 4, kind: output, shape index: {2}]  }
   0x1   :  { %12 = vsyncpa [#allocation3 + $0x1], 0 }
   0x2   :  { %13 = vsyncpa [#allocation5], 0 }
   0x3   :  { %15 = vsyncpa [#allocation5 + $0x1], 0  ;;  %s1806_s15 = smov 0   ;;  %s1808_s16 = smov 0  }
   0x4   :  { %s1810_s17 = smov 0   ;;  %s1812_s18 = smov 0  }
   0x5   :  { %s1814_s19 = smov 0   ;;  %s1816_s20 = smov 0  }
   0x6 LB: > { %s1458_s21 = sadd.s32 4294967295, %s1772_s20   ;;  %s1459_s22 = sadd.s32 4294967294, %s1772_s20   ;;  %s1772_s20 = sphi %s1816_s20, %s21_s20   ;;  %s1768_s19 = sphi %s1814_s19, %s3574_s19   ;;  %s1764_s18 = sphi %s1812_s18, %s3573_s18   ;;  %s1760_s17 = sphi %s1810_s17, %s3572_s17   ;;  %s1756_s16 = sphi %s1808_s16, %s3571_s16   ;;  %s1752_s15 = sphi %s1806_s15, %s3570_s15  }
   0x7   : > { %s33_s23 = sadd.s32 1, %s1768_s19  ;;  %s104_s24 = sadd.s32 1, %s1760_s17 }
   0x8   : > { %p35_p0 = scmp.ge.s32.totalorder %s33_s23, 2  ;;  %p114_p1 = scmp.ne.s32.totalorder %s1760_s17, %s1756_s16 }
   0x9   : > { %p115_p2 = scmp.eq.s32.totalorder %s1458_s21, 1  ;;  %p120_p3 = scmp.ne.s32.totalorder %s1756_s16, %s1752_s15 }
   0xa   : > { %s3576_s23 = smov (%p35_p0, %s33_s23), 0  ;;  %p121_p5 = scmp.eq.s32.totalorder %s1459_s22, 1 }
   0xb   : > { %p1848_p4 = por %p115_p2, %p114_p1  ;;  %s101_s26 = ssub.s32 %s1768_s19, %s3576_s23 }
   0xc   : > { %p1462_p6 = scmp.ge.s32.totalorder %s1772_s20, 1  ;;  %p102_p7 = scmp.eq.s32.totalorder %s101_s26, 0 }
   0xd   : > { %p1857_p8 = por %p121_p5, %p120_p3  ;;  %p221_p9 = scmp.lt.s32.totalorder %s1772_s20, 3 }
   0xe   : > { %s1863_s28 = scalar_select %p102_p7, %s1760_s17, %s104_s24  }
   0xf   : > { %p222_p10 = pnand %p1462_p6, %p221_p9 }
  0x11   : > { %225 = sbr.rel (%p222_p10) target bundleno = 494 (0x1ee), region = 28 }
  0x18   : > { %p269_p11 = scmp.lt.s32.totalorder %s1764_s18, 0  ;;  %s374_s29 = smul.u32 200, %s1764_s18  ;;  %v375_v0 = vlaneseq  ;;  %v3328_v1 = vmov 0   ;;  %v3410_v18 = vmov 0  ;;  %vm297_vm5 = vcmask 785408  }
  0x19   : > { %987 = vmatprep.subr.bf16.mxu0 %v3328_v1  ;;  %1157 = vmatprep.subr.bf16.mxu1 %v3328_v1  ;;  %v3419_v58 = vmov 0  ;;  %s2814_s13 = sand.u32 1, %s1756_s16  }
  0x1a   : > { %s270_s30 = scalar_select %p269_p11, %s1764_s18, 0  ;;  %v1870_v2 = vshrl.u32 %v375_v0, 7  ;;  %v1872_v3 = vstv %s374_s29 }
  0x1b   : > { %s1556_s14 = smul.u32 96, %s2814_s13  ;;  %s1463_s29 = sshll.u32 %s2814_s13, 3 }
  0x1c   : > { %s271_s5 = smul.u32 25, %s270_s30  ;;  %v392_v4 = vadd.s32 128, %v1870_v2  ;;  %v393_v5 = vadd.s32 136, %v1870_v2  ;;  %v377_v6 = vadd.s32 8, %v1870_v2  ;;  %v1879_v7 = vadd.s32 %v1872_v3, %v1870_v2  ;;  %s3101_s30 = scalar_lea.vmem [#allocation2], %s1463_s29 }
  0x1d   : > { %v394_v8 = vadd.s32 144, %v1870_v2  ;;  %v395_v9 = vadd.s32 152, %v1870_v2  ;;  %v378_v10 = vadd.s32 16, %v1870_v2  ;;  %v379_v14 = vadd.s32 24, %v1870_v2  ;;  %s2881_s24 = scalar_lea.vmem [#allocation4], %s1556_s14  ;;  %s3052_s26 = scalar_lea.vmem [#allocation6], %s1556_s14 }
  0x1e   : > { %p272_p12 = scmp.lt.s32.totalorder %s271_s5, 24  ;;  %v1885_v11 = vadd.s32 %v1872_v3, %v392_v4  ;;  %v1888_v12 = vadd.s32 %v1872_v3, %v393_v5  ;;  %v1891_v13 = vadd.s32 %v1872_v3, %v377_v6  ;;  %vm3379_vm0 = vcmp.lt.s32.totalorder %v1879_v7, 200  ;;  %s1263_s10 = scalar_lea.sflag [#allocation3], %s2814_s13 }
  0x1f   : > { %v1899_v15 = vadd.s32 %v1872_v3, %v394_v8  ;;  %v1902_v16 = vadd.s32 %v1872_v3, %v395_v9  ;;  %v1905_v17 = vadd.s32 %v1872_v3, %v378_v10  ;;  %v1919_v19 = vadd.s32 %v1872_v3, %v379_v14 }
  0x20   : > { %s3578_s5 = smov (!%p272_p12, %s271_s5), 24  ;;  %vm3377_vm1 = vcmp.lt.s32.totalorder %v1891_v13, 200  ;;  %vm443_vm3 = vcmp.lt.s32.totalorder %v1885_v11, 200  ;;  %vm444_vm4 = vcmp.lt.s32.totalorder %v1888_v12, 200  ;;  %v396_v20 = vadd.s32 160, %v1870_v2 }
  0x21   : > { %vm1911_vm2 = vmpackc.low %vm3377_vm1, %vm3379_vm0  ;;  %s1464_s6 = sshll.u32 %s3578_s5, 3  ;;  %vm3356_vm6 = vcmp.lt.s32.totalorder %v1899_v15, 200  ;;  %vm3324_vm7 = vcmp.lt.s32.totalorder %v1902_v16, 200  ;;  %v397_v24 = vadd.s32 168, %v1870_v2  ;;  %vm3323_vm8 = vcmp.lt.s32.totalorder %v1905_v17, 200  ;;  %s1551_s5 = sshll.u32 %s1764_s18, 7 }
  0x22   : > { %v3411_v18 = vsel %vm1911_vm2, 4294967295, %v3410_v18  ;;  %s1927_s9 = scalar_lea.vmem %s3315_s0, %s1464_s6  ;;  %vm3322_vm9 = vcmp.lt.s32.totalorder %v1919_v19, 200  ;;  %v1967_v32 = vadd.s32 %v1872_v3, %v396_v20  ;;  %v380_v37 = vadd.s32 32, %v1870_v2  ;;  %vm2030_vm12 = vmpackc.low %vm444_vm4, %vm443_vm3  ;;  %s2173_s12 = scalar_lea.vmem %s3316_s1, %s1464_s6 }
  0x23   : > { %3412 = vst [vmem:[#allocation9_spill] sm:$0xff] %v3411_v18  ;;  %v1930_v21 = vld [vmem:[%s1927_s9 + $0x80] sm:$0xff]  ;;  %v1933_v22 = vld [vmem:[%s1927_s9 + $0x88] sm:$0xff]  ;;  %v341_v31 = vld [vmem:[%s1927_s9 + $0x90] sm:$0xff]  ;;  %v1987_v41 = vadd.s32 %v1872_v3, %v397_v24  ;;  %v381_v47 = vadd.s32 40, %v1870_v2  ;;  %v398_v53 = vadd.s32 176, %v1870_v2  ;;  %s3120_s8 = scalar_lea.hbm %s3317_s2, %s1551_s5 }
  0x24   : > { %3413 = vst [vmem:[#allocation10_spill] sm:$0xff] %v1930_v21  ;;  %3414 = vst [vmem:[#allocation11_spill] sm:$0xff] %v1933_v22  ;;  %v1936_v23 = vld [vmem:[%s1927_s9] sm:$0xff]  ;;  %v1944_v25 = vsel %vm443_vm3, %v1930_v21, 0.0  ;;  %v1949_v26 = vsel %vm444_vm4, %v1933_v22, 0.0  ;;  %v1954_v28 = vld [vmem:[%s1927_s9 + $0x8] sm:$0xff]  ;;  %v2024_v57 = vadd.s32 %v1872_v3, %v380_v37 }
  0x25   : > { %3415 = vst [vmem:[#allocation12_spill] sm:$0xff] %v1936_v23  ;;  %3416 = vst [vmem:[#allocation13_spill] sm:$0xff] %v1954_v28  ;;  %v1959_v29 = vsel %vm3379_vm0, %v1936_v23, 0.0  ;;  %v902_v30 = vpack.c.bf16 %v1949_v26, %v1944_v25  ;;  %v1972_v33 = vsel %vm3377_vm1, %v1954_v28, 0.0  ;;  %v342_v36 = vld [vmem:[%s1927_s9 + $0x98] sm:$0xff]  ;;  %v1992_v44 = vsel %vm3356_vm6, %v341_v31, 0.0 }
  0x26   : > { %v529_v34 = vsel %vm297_vm5, %v1959_v29, 0.0  ;;  %v588_v35 = vmul.f32 %v1959_v29, %v1959_v29  ;;  %v530_v38 = vsel %vm297_vm5, %v1972_v33, 0.0  ;;  %v589_v39 = vmul.f32 %v1972_v33, %v1972_v33  ;;  %v1995_v45 = vld [vmem:[%s1927_s9 + $0x10] sm:$0xff]  ;;  %v1998_v46 = vld [vmem:[%s1927_s9 + $0x18] sm:$0xff]  ;;  %v343_v52 = vld [vmem:[%s1927_s9 + $0xa0] sm:$0xff] }
  0x27   : > { %948 = vxpose.xlu0.c.b16.start [1/5] (short) (narrow) %v902_v30, 96  ;;  %v894_v40 = vpack.c.bf16 %v1972_v33, %v1959_v29  ;;  %v531_v42 = vadd.f32 %v530_v38, %v529_v34  ;;  %3417 = vst [vmem:[#allocation14_spill] sm:$0xff] %v1995_v45  ;;  %3418 = vst [vmem:[#allocation15_spill] sm:$0xff] %v1998_v46  ;;  %v2004_v49 = vsel %vm3324_vm7, %v342_v36, 0.0  ;;  %vm3326_vm10 = vcmp.lt.s32.totalorder %v1967_v32, 200  ;;  %v344_v56 = vld [vmem:[%s1927_s9 + $0xa8] sm:$0xff] }
  0x28   : > { %v613_v43 = vsel %vm297_vm5, %v588_v35, 0.0  ;;  %v614_v48 = vsel %vm297_vm5, %v589_v39, 0.0  ;;  %v903_v51 = vpack.c.bf16 %v2004_v49, %v1992_v44  ;;  %v2014_v54 = vsel %vm3323_vm8, %v1995_v45, 0.0  ;;  %v2057_v9 = vld [vmem:[%s1927_s9 + $0x20] sm:$0xff]  ;;  %v2061_v24 = vld [vmem:[%s1927_s9 + $0x28] sm:$0xff] }
  0x29   : > { %932 = vxpose.xlu1.c.b16.start [1/8] (narrow) %v894_v40, 96  ;;  %v615_v50 = vadd.f32 %v614_v48, %v613_v43  ;;  %v2019_v55 = vsel %vm3322_vm9, %v1998_v46, 0.0  ;;  %vm3325_vm11 = vcmp.lt.s32.totalorder %v1987_v41, 200  ;;  %v3420_v58 = vsel %vm2030_vm12, 4294967295, %v3419_v58  ;;  %3422 = vst [vmem:[#allocation17_spill] sm:$0xff] %v2057_v9  ;;  %3423 = vst [vmem:[#allocation18_spill] sm:$0xff] %v2061_v24 }
  0x2a   : > { %3421 = vst [vmem:[#allocation16_spill] sm:$0xff] %v3420_v58  ;;  %v532_v59 = vsel %vm297_vm5, %v2014_v54, 0.0  ;;  %v534_v60 = vsel %vm297_vm5, %v2019_v55, 0.0  ;;  %v590_v61 = vmul.f32 %v2014_v54, %v2014_v54  ;;  %v2041_v62 = vadd.s32 %v1872_v3, %v381_v47  ;;  %vm2135_vm8 = vmpackc.low %vm3325_vm11, %vm3326_vm10 }
  0x2b   : > { %949 = vxpose.xlu0.c.b16.cont [2/5] (short) (narrow) %v903_v51, 96  ;;  %v591_v63 = vmul.f32 %v2019_v55, %v2019_v55  ;;  %v895_v0 = vpack.c.bf16 %v2019_v55, %v2014_v54  ;;  %v533_v4 = vadd.f32 %v532_v59, %v531_v42  ;;  %v2049_v5 = vsel %vm3326_vm10, %v343_v52, 0.0  ;;  %v345_v42 = vld [vmem:[%s1927_s9 + $0xb0] sm:$0xff] }
  0x2c   : > { %v616_v6 = vsel %vm297_vm5, %v590_v61, 0.0  ;;  %v2054_v8 = vsel %vm3325_vm11, %v344_v56, 0.0  ;;  %vm3321_vm13 = vcmp.lt.s32.totalorder %v2024_v57, 200  ;;  %v399_v31 = vadd.s32 184, %v1870_v2  ;;  %v346_v56 = vld [vmem:[%s1927_s9 + $0xb8] sm:$0xff] }
  0x2d   : > { %v618_v10 = vsel %vm297_vm5, %v591_v63, 0.0  ;;  %933 = vxpose.xlu1.c.b16.cont [2/8] (narrow) %v895_v0, 96  ;;  %v535_v14 = vadd.f32 %v534_v60, %v533_v4  ;;  %v617_v20 = vadd.f32 %v616_v6, %v615_v50  ;;  %v904_v30 = vpack.c.bf16 %v2054_v8, %v2049_v5 }
  0x2e   : > { %v382_v34 = vadd.s32 48, %v1870_v2  ;;  %vm3320_vm14 = vcmp.lt.s32.totalorder %v2041_v62, 200  ;;  %v2072_v36 = vsel %vm3321_vm13, %v2057_v9, 0.0  ;;  %v2075_v37 = vadd.s32 %v1872_v3, %v398_v53 }
  0x2f   : > { %v619_v35 = vadd.f32 %v618_v10, %v617_v20  ;;  %950 = vxpose.xlu0.c.b16.cont [3/5] (short) (narrow) %v904_v30, 96  ;;  %v2080_v38 = vsel %vm3320_vm14, %v2061_v24, 0.0  ;;  %v536_v39 = vsel %vm297_vm5, %v2072_v36, 0.0  ;;  %v592_v40 = vmul.f32 %v2072_v36, %v2072_v36  ;;  %vm2092_vm15 = vmpackc.low %vm3320_vm14, %vm3321_vm13  ;;  %v2126_v10 = vld [vmem:[%s1927_s9 + $0x30] sm:$0xff]  ;;  %v2281_v24 = vld [vmem:[%s1927_s9 + $0x58] sm:$0xff] }
  0x30   : > { %v383_v43 = vadd.s32 56, %v1870_v2  ;;  %v3424_v47 = vmov 0  ;;  %v538_v48 = vsel %vm297_vm5, %v2080_v38, 0.0  ;;  %v593_v50 = vmul.f32 %v2080_v38, %v2080_v38  ;;  %vm2120_vm13 = vmpackc.low %vm3324_vm7, %vm3356_vm6  ;;  %3430 = vst [vmem:[#allocation21_spill] sm:$0xff] %v2126_v10 }
  0x31   : > { %v3425_v47 = vsel %vm2092_vm15, 4294967295, %v3424_v47  ;;  %v896_v51 = vpack.c.bf16 %v2080_v38, %v2072_v36  ;;  %v537_v52 = vadd.f32 %v536_v39, %v535_v14  ;;  %v620_v53 = vsel %vm297_vm5, %v592_v40, 0.0  ;;  %3449 = vst [vmem:[#allocation34_spill] sm:$0xff] %v2281_v24 }
  0x32   : > { %3426 = vst [vmem:[#allocation19_spill] sm:$0xff] %v3425_v47  ;;  %v2105_v59 = vadd.s32 %v1872_v3, %v399_v31  ;;  %vm3334_vm14 = vcmp.lt.s32.totalorder %v2075_v37, 200  ;;  %v2109_v60 = vadd.s32 %v1872_v3, %v382_v34  ;;  %v622_v61 = vsel %vm297_vm5, %v593_v50, 0.0  ;;  %v2144_v34 = vld [vmem:[%s1927_s9 + $0x38] sm:$0xff]  ;;  %v2278_v47 = vld [vmem:[%s1927_s9 + $0x50] sm:$0xff] }
  0x33   : > { %934 = vxpose.xlu1.c.b16.cont [3/8] (narrow) %v896_v51, 96  ;;  %v539_v63 = vadd.f32 %v538_v48, %v537_v52  ;;  %v621_v0 = vadd.f32 %v620_v53, %v619_v35  ;;  %v2114_v4 = vsel %vm3334_vm14, %v345_v42, 0.0  ;;  %v3427_v6 = vmov 0  ;;  %3434 = vst [vmem:[#allocation23_spill] sm:$0xff] %v2144_v34  ;;  %3448 = vst [vmem:[#allocation33_spill] sm:$0xff] %v2278_v47 }
  0x34   : > { %v3428_v6 = vsel %vm2120_vm13, 4294967295, %v3427_v6  ;;  %vm3327_vm9 = vcmp.lt.s32.totalorder %v2105_v59, 200  ;;  %v2129_v14 = vadd.s32 %v1872_v3, %v383_v43  ;;  %v3431_v20 = vmov 0 }
  0x35   : > { %3429 = vst [vmem:[#allocation20_spill] sm:$0xff] %v3428_v6  ;;  %v3432_v20 = vsel %vm2135_vm8, 4294967295, %v3431_v20  ;;  %v623_v30 = vadd.f32 %v622_v61, %v621_v0  ;;  %v2141_v31 = vsel %vm3327_vm9, %v346_v56, 0.0  ;;  %vm3352_vm7 = vcmp.lt.s32.totalorder %v2109_v60, 200  ;;  %vm2152_vm11 = vmpackc.low %vm3327_vm9, %vm3334_vm14  ;;  %v347_v61 = vld [vmem:[%s1927_s9 + $0xc0] sm:$0xff] }
  0x36   : > { %3433 = vst [vmem:[#allocation22_spill] sm:$0xff] %v3432_v20  ;;  %v400_v35 = vadd.s32 192, %v1870_v2  ;;  %v3435_v39 = vmov 0  ;;  %v605_v40 = vmul.f32 %v1949_v26, %v1949_v26  ;;  %v905_v42 = vpack.c.bf16 %v2141_v31, %v2114_v4 }
  0x37   : > { %v3436_v39 = vsel %vm2152_vm11, 4294967295, %v3435_v39  ;;  %vm3344_vm10 = vcmp.lt.s32.totalorder %v2129_v14, 200  ;;  %v2164_v43 = vsel %vm3352_vm7, %v2126_v10, 0.0  ;;  %v384_v50 = vadd.s32 64, %v1870_v2 }
  0x38   : > { %3437 = vst [vmem:[#allocation24_spill] sm:$0xff] %v3436_v39  ;;  %v426_v48 = vadd.s32 %v1872_v3, %v400_v35  ;;  %v604_v51 = vmul.f32 %v1944_v25, %v1944_v25  ;;  %951 = vxpose.xlu0.c.b16.cont [4/5] (short) (narrow) %v905_v42, 96  ;;  %v2180_v52 = vsel %vm3344_vm10, %v2144_v34, 0.0  ;;  %v540_v53 = vsel %vm297_vm5, %v2164_v43, 0.0  ;;  %vm2191_vm9 = vmpackc.low %vm3344_vm10, %vm3352_vm7  ;;  %v372_v39 = vld [vmem:[%s2173_s12 + $0xc0] sm:$0xff] }
  0x39   : > { %v594_v56 = vmul.f32 %v2164_v43, %v2164_v43  ;;  %v3438_v0 = vmov 0  ;;  %v542_v35 = vsel %vm297_vm5, %v2180_v52, 0.0  ;;  %v595_v42 = vmul.f32 %v2180_v52, %v2180_v52 }
  0x3a   : > { %v3439_v0 = vsel %vm2191_vm9, 4294967295, %v3438_v0  ;;  %v897_v27 = vpack.c.bf16 %v2180_v52, %v2164_v43  ;;  %v541_v1 = vadd.f32 %v540_v53, %v539_v63  ;;  %vm451_vm14 = vcmp.lt.s32.totalorder %v426_v48, 200 }
  0x3b   : > { %3440 = vst [vmem:[#allocation25_spill] sm:$0xff] %v3439_v0  ;;  %v624_v20 = vsel %vm297_vm5, %v594_v56, 0.0  ;;  %v385_v6 = vadd.s32 72, %v1870_v2  ;;  %v2205_v58 = vadd.s32 %v1872_v3, %v384_v50  ;;  %v626_v21 = vsel %vm297_vm5, %v595_v42, 0.0  ;;  %v2221_v50 = vld [vmem:[%s1927_s9 + $0x40] sm:$0xff] }
  0x3c   : > { %935 = vxpose.xlu1.c.b16.cont [4/8] (narrow) %v897_v27, 96  ;;  %v543_v22 = vadd.f32 %v542_v35, %v541_v1  ;;  %v625_v0 = vadd.f32 %v624_v20, %v623_v30  ;;  %v2208_v34 = vsel %vm451_vm14, %v347_v61, 0.0  ;;  %v2212_v63 = vsel %vm297_vm5, %v1949_v26, 0.0  ;;  %3442 = vst [vmem:[#allocation27_spill] sm:$0xff] %v2221_v50 }
  0x3d   : > { %v2214_v53 = vsel %vm451_vm14, %v372_v39, 0.0  ;;  %v2218_v48 = vpack.c.bf16 %v2208_v34, %v2208_v34  ;;  %v2224_v56 = vsel %vm297_vm5, %v605_v40, 0.0  ;;  %v2228_v1 = vsel %vm297_vm5, %v1944_v25, 0.0  ;;  %v2239_v39 = vld [vmem:[%s1927_s9 + $0x48] sm:$0xff] }
  0x3e   : > { %v627_v27 = vadd.f32 %v626_v21, %v625_v0  ;;  %v2232_v20 = vsub.f32 %v2208_v34, %v2214_v53  ;;  %v2235_v30 = vsel %vm297_vm5, %v604_v51, 0.0  ;;  %3444 = vst [vmem:[#allocation29_spill] sm:$0xff] %v2239_v39  ;;  %v2242_v40 = vadd.s32 %v1872_v3, %v385_v6 }
  0x3f   : > { %3441 = vst [vmem:[#allocation26_spill] sm:$0xff] %v2218_v48  ;;  %952 = vxpose.xlu0.c.b16.end [5/5] (short) (narrow) %v2218_v48, 96  ;;  %vm3362_vm14 = vcmp.lt.s32.totalorder %v2205_v58, 200  ;;  %v386_v21 = vadd.s32 80, %v1870_v2  ;;  %v2248_v61 = vsel %vm297_vm5, %v1992_v44, 0.0  ;;  %v2252_v51 = vmul.f32 %v1992_v44, %v1992_v44 }
  0x40   : > { %3443 = vst [vmem:[#allocation28_spill] sm:$0xff] %v2232_v20  ;;  %v2257_v0 = vsel %vm3362_vm14, %v2221_v50, 0.0  ;;  %v387_v6 = vadd.s32 88, %v1870_v2  ;;  %vm3357_vm10 = vcmp.lt.s32.totalorder %v2242_v40, 200  ;;  %v2270_v20 = vmul.f32 %v2004_v49, %v2004_v49 }
  0x41   : > { %3445 = vst [vmem:[#allocation30_spill] sm:$0xff] %v2257_v0  ;;  %v544_v35 = vsel %vm297_vm5, %v2257_v0, 0.0  ;;  %v596_v42 = vmul.f32 %v2257_v0, %v2257_v0  ;;  %v2266_v48 = vadd.s32 %v1872_v3, %v386_v21  ;;  %v2275_v50 = vsel %vm3357_vm10, %v2239_v39, 0.0  ;;  %vm2290_vm7 = vmpackc.low %vm3357_vm10, %vm3362_vm14 }
  0x42   : > { %3447 = vst [vmem:[#allocation32_spill] sm:$0xff] %v2275_v50  ;;  %v545_v10 = vadd.f32 %v544_v35, %v543_v22  ;;  %v2284_v9 = vadd.s32 %v1872_v3, %v387_v6  ;;  %v3451_v21 = vmov 0  ;;  %v546_v39 = vsel %vm297_vm5, %v2275_v50, 0.0 }
  0x43   : > { %3446 = vst [vmem:[#allocation31_spill] sm:$0xff] %v2266_v48  ;;  %v3452_v21 = vsel %vm2290_vm7, 4294967295, %v3451_v21  ;;  %v597_v22 = vmul.f32 %v2275_v50, %v2275_v50  ;;  %v628_v35 = vsel %vm297_vm5, %v596_v42, 0.0  ;;  %v898_v6 = vpack.c.bf16 %v2275_v50, %v2257_v0  ;;  %v2344_v50 = vld [vmem:[%s2173_s12 + $0x88] sm:$0xff] }
  0x44   : > { %3450 = vst [vmem:[#allocation35_spill] sm:$0xff] %v2284_v9  ;;  %3453 = vst [vmem:[#allocation36_spill] sm:$0xff] %v3452_v21  ;;  %v547_v46 = vadd.f32 %v546_v39, %v545_v10  ;;  %v629_v45 = vadd.f32 %v628_v35, %v627_v27  ;;  %vm3376_vm6 = vcmp.lt.s32.totalorder %v2266_v48, 200  ;;  %vm3374_vm10 = vcmp.lt.s32.totalorder %v2284_v9, 200 }
  0x45   : > { %v630_v21 = vsel %vm297_vm5, %v597_v22, 0.0  ;;  %936 = vxpose.xlu1.c.b16.cont [5/8] (narrow) %v898_v6, 96  ;;  %v2307_v18 = vsel %vm3376_vm6, %v2278_v47, 0.0  ;;  %v2312_v42 = vsel %vm3374_vm10, %v2281_v24, 0.0  ;;  %v388_v10 = vadd.s32 96, %v1870_v2  ;;  %vm2319_vm14 = vmpackc.low %vm3374_vm10, %vm3376_vm6  ;;  %3461 = vst [vmem:[#allocation42_spill] sm:$0xff] %v2344_v50 }
  0x46   : > { %3454 = vst [vmem:[#allocation37_spill] sm:$0xff] %v2307_v18  ;;  %3455 = vst [vmem:[#allocation38_spill] sm:$0xff] %v2312_v42  ;;  %v3456_v27 = vmov 0  ;;  %v631_v39 = vadd.f32 %v630_v21, %v629_v45  ;;  %v548_v22 = vsel %vm297_vm5, %v2307_v18, 0.0  ;;  %v550_v35 = vsel %vm297_vm5, %v2312_v42, 0.0  ;;  %v2336_v21 = vld [vmem:[%s1927_s9 + $0x60] sm:$0xff] }
  0x47   : > { %v3457_v27 = vsel %vm2319_vm14, 4294967295, %v3456_v27  ;;  %v598_v6 = vmul.f32 %v2307_v18, %v2307_v18  ;;  %v599_v24 = vmul.f32 %v2312_v42, %v2312_v42  ;;  %v899_v47 = vpack.c.bf16 %v2312_v42, %v2307_v18  ;;  %3459 = vst [vmem:[#allocation40_spill] sm:$0xff] %v2336_v21  ;;  %v2348_v42 = vld [vmem:[%s1927_s9 + $0x68] sm:$0xff] }
  0x48   : > { %3458 = vst [vmem:[#allocation39_spill] sm:$0xff] %v3457_v27  ;;  %v549_v28 = vadd.f32 %v548_v22, %v547_v46  ;;  %v389_v27 = vadd.s32 104, %v1870_v2  ;;  %v2339_v23 = vadd.s32 %v1872_v3, %v388_v10  ;;  %v390_v9 = vadd.s32 112, %v1870_v2  ;;  %3462 = vst [vmem:[#allocation43_spill] sm:$0xff] %v2348_v42 }
  0x49   : > { %v632_v45 = vsel %vm297_vm5, %v598_v6, 0.0  ;;  %v391_v48 = vadd.s32 120, %v1870_v2  ;;  %v634_v0 = vsel %vm297_vm5, %v599_v24, 0.0  ;;  %937 = vxpose.xlu1.c.b16.cont [6/8] (narrow) %v899_v47, 96  ;;  %v608_v10 = vmul.f32 %v2049_v5, %v2049_v5  ;;  %v2369_v47 = vld [vmem:[%s1927_s9 + $0x70] sm:$0xff] }
  0x4a   : > { %3460 = vst [vmem:[#allocation41_spill] sm:$0xff] %v2339_v23  ;;  %v551_v46 = vadd.f32 %v550_v35, %v549_v28  ;;  %v633_v22 = vadd.f32 %v632_v45, %v631_v39  ;;  %v2351_v6 = vadd.s32 %v1872_v3, %v389_v27  ;;  %vm439_vm10 = vcmp.lt.s32.totalorder %v2339_v23, 200  ;;  %3467 = vst [vmem:[#allocation48_spill] sm:$0xff] %v2369_v47 }
  0x4b   : > { %v2357_v2 = vadd.s32 %v1872_v3, %v390_v9  ;;  %v2360_v18 = vadd.s32 %v1872_v3, %v391_v48  ;;  %v2366_v28 = vsel %vm439_vm10, %v2336_v21, 0.0  ;;  %v2374_v27 = vsel %vm444_vm4, %v2344_v50, 0.0 }
  0x4c   : > { %3463 = vst [vmem:[#allocation44_spill] sm:$0xff] %v2351_v6  ;;  %v635_v24 = vadd.f32 %v634_v0, %v633_v22  ;;  %vm3386_vm6 = vcmp.lt.s32.totalorder %v2351_v6, 200  ;;  %3466 = vst [vmem:[#allocation47_spill] sm:$0xff] %v2366_v28  ;;  %v552_v9 = vsel %vm297_vm5, %v2366_v28, 0.0  ;;  %v600_v48 = vmul.f32 %v2366_v28, %v2366_v28  ;;  %v2386_v0 = vld [vmem:[%s1927_s9 + $0x78] sm:$0xff] }
  0x4d   : > { %3464 = vst [vmem:[#allocation45_spill] sm:$0xff] %v2357_v2  ;;  %3465 = vst [vmem:[#allocation46_spill] sm:$0xff] %v2360_v18  ;;  %v2379_v3 = vsel %vm3386_vm6, %v2348_v42, 0.0  ;;  %vm441_vm1 = vcmp.lt.s32.totalorder %v2357_v2, 200  ;;  %v3470_v12 = vmov 0  ;;  %v553_v22 = vadd.f32 %v552_v9, %v551_v46 }
  0x4e   : > { %3468 = vst [vmem:[#allocation49_spill] sm:$0xff] %v2379_v3  ;;  %3469 = vst [vmem:[#allocation50_spill] sm:$0xff] %v2386_v0  ;;  %v554_v39 = vsel %vm297_vm5, %v2379_v3, 0.0  ;;  %v601_v35 = vmul.f32 %v2379_v3, %v2379_v3  ;;  %v900_v45 = vpack.c.bf16 %v2379_v3, %v2366_v28  ;;  %v636_v50 = vsel %vm297_vm5, %v600_v48, 0.0 }
  0x4f   : > { %vm2393_vm4 = vmpackc.low %vm3386_vm6, %vm439_vm10  ;;  %vm3394_vm0 = vcmp.lt.s32.totalorder %v2360_v18, 200  ;;  %v2408_v42 = vsel %vm441_vm1, %v2369_v47, 0.0  ;;  %v2415_v21 = vsub.f32 %v1949_v26, %v2374_v27  ;;  %v555_v3 = vadd.f32 %v554_v39, %v553_v22 }
  0x50   : > { %v3471_v12 = vsel %vm2393_vm4, 4294967295, %v3470_v12  ;;  %3473 = vst [vmem:[#allocation52_spill] sm:$0xff] %v2408_v42  ;;  %v638_v6 = vsel %vm297_vm5, %v601_v35, 0.0  ;;  %938 = vxpose.xlu1.c.b16.cont [7/8] (narrow) %v900_v45, 96  ;;  %v637_v46 = vadd.f32 %v636_v50, %v635_v24  ;;  %v2421_v9 = vsel %vm3394_vm0, %v2386_v0, 0.0  ;;  %vm2427_vm6 = vmpackc.low %vm3394_vm0, %vm441_vm1 }
  0x51   : > { %3472 = vst [vmem:[#allocation51_spill] sm:$0xff] %v3471_v12  ;;  %v2411_v12 = vld [vmem:[%s2173_s12 + $0x80] sm:$0xff]  ;;  %3475 = vst [vmem:[#allocation54_spill] sm:$0xff] %v2421_v9  ;;  %v3476_v48 = vmov 0  ;;  %v556_v26 = vsel %vm297_vm5, %v2408_v42, 0.0  ;;  %v558_v39 = vsel %vm297_vm5, %v2421_v9, 0.0  ;;  %v602_v50 = vmul.f32 %v2408_v42, %v2408_v42 }
  0x52   : > { %3474 = vst [vmem:[#allocation53_spill] sm:$0xff] %v2411_v12  ;;  %v3477_v48 = vsel %vm2427_vm6, 4294967295, %v3476_v48  ;;  %v603_v24 = vmul.f32 %v2421_v9, %v2421_v9  ;;  %v639_v35 = vadd.f32 %v638_v6, %v637_v46  ;;  %v901_v45 = vpack.c.bf16 %v2421_v9, %v2408_v42  ;;  %v2453_v6 = vld [vmem:[%s2173_s12] sm:$0xff] }
  0x53   : > { %3478 = vst [vmem:[#allocation55_spill] sm:$0xff] %v3477_v48  ;;  %v557_v22 = vadd.f32 %v556_v26, %v555_v3  ;;  %v2444_v48 = vsel %vm443_vm3, %v2411_v12, 0.0  ;;  %v566_v0 = vsel %vm297_vm5, %v2004_v49, 0.0  ;;  %v648_v47 = vsel %vm297_vm5, %v2252_v51, 0.0  ;;  %3479 = vst [vmem:[#allocation56_spill] sm:$0xff] %v2453_v6  ;;  %v2460_v12 = vld [vmem:[%s2173_s12 + $0x8] sm:$0xff] }
  0x54   : > { %v640_v18 = vsel %vm297_vm5, %v602_v50, 0.0  ;;  %v642_v2 = vsel %vm297_vm5, %v603_v24, 0.0  ;;  %v650_v3 = vsel %vm297_vm5, %v2270_v20, 0.0  ;;  %v568_v11 = vsel %vm297_vm5, %v2049_v5, 0.0  ;;  %939 = vxpose.xlu1.c.b16.end [8/8] (narrow) %v901_v45, 96  ;;  %3480 = vst [vmem:[#allocation57_spill] sm:$0xff] %v2460_v12 }
  0x55   : > { %v559_v46 = vadd.f32 %v558_v39, %v557_v22  ;;  %v641_v26 = vadd.f32 %v640_v18, %v639_v35  ;;  %v570_v51 = vsel %vm297_vm5, %v2054_v8, 0.0  ;;  %v609_v50 = vmul.f32 %v2054_v8, %v2054_v8 }
  0x56   : > { %v915_v24 = vpack.c.bf16 %v2374_v27, %v2444_v48  ;;  %v2470_v20 = vsub.f32 %v1944_v25, %v2444_v48  ;;  %v652_v45 = vsel %vm297_vm5, %v608_v10, 0.0  ;;  %vm3481_vm3 = vcmp.lt.s32.totalorder %v1879_v7, 200 }
  0x57   : > { %v561_v18 = vadd.f32 %v2228_v1, %v559_v46  ;;  %v643_v39 = vadd.f32 %v642_v2, %v641_v26  ;;  %v477_v35 = vsel %vm3481_vm3, %v2453_v6, 0.0  ;;  %v610_v22 = vmul.f32 %v2114_v4, %v2114_v4  ;;  %v2488_v46 = vld [vmem:[%s2173_s12 + $0x90] sm:$0xff] }
  0x58   : > { %1120 = vxpose.xlu0.c.b16.start [1/5] (short) (narrow) %v915_v24, 96  ;;  %vm3482_vm0 = vcmp.lt.s32.totalorder %v1891_v13, 200  ;;  %v671_v25 = vsel %vm297_vm5, %v477_v35, 0.0  ;;  %v729_v42 = vmul.f32 %v477_v35, %v477_v35  ;;  %v611_v26 = vmul.f32 %v2141_v31, %v2141_v31 }
  0x59   : > { %v478_v9 = vsel %vm3482_vm0, %v2460_v12, 0.0  ;;  %v563_v10 = vadd.f32 %v2212_v63, %v561_v18  ;;  %v645_v1 = vadd.f32 %v2235_v30, %v643_v39  ;;  %v2494_v12 = vld [vmem:[%s2173_s12 + $0x98] sm:$0xff]  ;;  %v502_v23 = vsub.f32 %v1959_v29, %v477_v35 }
  0x5a   : > { %v503_v2 = vsub.f32 %v1972_v33, %v478_v9  ;;  %v672_v7 = vsel %vm297_vm5, %v478_v9, 0.0  ;;  %v730_v6 = vmul.f32 %v478_v9, %v478_v9  ;;  %v754_v13 = vsel %vm297_vm5, %v729_v42, 0.0 }
  0x5b   : > { %v673_v24 = vadd.f32 %v672_v7, %v671_v25  ;;  %v565_v28 = vadd.f32 %v2248_v61, %v563_v10  ;;  %v647_v63 = vadd.f32 %v2224_v56, %v645_v1  ;;  %v907_v18 = vpack.c.bf16 %v478_v9, %v477_v35  ;;  %v2528_v1 = vld [vmem:[%s2173_s12 + $0x10] sm:$0xff] }
  0x5c   : > { %v813_v30 = vmul.f32 %v503_v2, %v503_v2  ;;  %v612_v33 = vmul.f32 %v2208_v34, %v2208_v34  ;;  %v755_v39 = vsel %vm297_vm5, %v730_v6, 0.0  ;;  %vm3483_vm0 = vcmp.lt.s32.totalorder %v1899_v15, 200 }
  0x5d   : > { %v2505_v25 = vsel %vm3483_vm0, %v2488_v46, 0.0  ;;  %v567_v42 = vadd.f32 %v566_v0, %v565_v28  ;;  %v649_v61 = vadd.f32 %v648_v47, %v647_v63  ;;  %v756_v10 = vadd.f32 %v755_v39, %v754_v13  ;;  %1104 = vxpose.xlu1.c.b16.start [1/8] (narrow) %v907_v18, 96 }
  0x5e   : > { %vm3484_vm3 = vcmp.lt.s32.totalorder %v1902_v16, 200  ;;  %v838_v9 = vsel %vm297_vm5, %v813_v30, 0.0  ;;  %v812_v6 = vmul.f32 %v502_v23, %v502_v23  ;;  %v2515_v29 = vsub.f32 %v1992_v44, %v2505_v25  ;;  %v2531_v44 = vld [vmem:[%s2173_s12 + $0x18] sm:$0xff] }
  0x5f   : > { %v2510_v56 = vsel %vm3484_vm3, %v2494_v12, 0.0  ;;  %v569_v28 = vadd.f32 %v568_v11, %v567_v42  ;;  %v651_v47 = vadd.f32 %v650_v3, %v649_v61  ;;  %v654_v0 = vsel %vm297_vm5, %v609_v50, 0.0 }
  0x60   : > { %v2519_v15 = vsub.f32 %v2004_v49, %v2510_v56  ;;  %v572_v16 = vsel %vm297_vm5, %v2114_v4, 0.0  ;;  %v574_v35 = vsel %vm297_vm5, %v2141_v31, 0.0  ;;  %v837_v23 = vsel %vm297_vm5, %v812_v6, 0.0 }
  0x61   : > { %v656_v2 = vsel %vm297_vm5, %v610_v22, 0.0  ;;  %v571_v49 = vadd.f32 %v570_v51, %v569_v28  ;;  %v653_v7 = vadd.f32 %v652_v45, %v651_v47  ;;  %v839_v11 = vadd.f32 %v838_v9, %v837_v23 }
  0x62   : > { %v658_v3 = vsel %vm297_vm5, %v611_v26, 0.0  ;;  %v576_v50 = vsel %vm297_vm5, %v2208_v34, 0.0  ;;  %v660_v13 = vsel %vm297_vm5, %v612_v33, 0.0  ;;  %v916_v63 = vpack.c.bf16 %v2510_v56, %v2505_v25 }
  0x63   : > { %v573_v30 = vadd.f32 %v572_v16, %v571_v49  ;;  %v655_v18 = vadd.f32 %v654_v0, %v653_v7  ;;  %vm3485_vm0 = vcmp.lt.s32.totalorder %v1905_v17, 200  ;;  %vm3486_vm3 = vcmp.lt.s32.totalorder %v1919_v19, 200  ;;  %v2551_v16 = vld [vmem:[%s2173_s12 + $0xa0] sm:$0xff]  ;;  %v2557_v7 = vld [vmem:[%s2173_s12 + $0xa8] sm:$0xff] }
  0x64   : > { %v479_v22 = vsel %vm3485_vm0, %v2528_v1, 0.0  ;;  %v480_v51 = vsel %vm3486_vm3, %v2531_v44, 0.0  ;;  %1121 = vxpose.xlu0.c.b16.cont [2/5] (short) (narrow) %v916_v63, 96  ;;  %vm3489_vm0 = vcmp.lt.s32.totalorder %v1967_v32, 200  ;;  %vm3490_vm3 = vcmp.lt.s32.totalorder %v1987_v41, 200  ;;  %v2586_v32 = vld [vmem:[%s2173_s12 + $0x28] sm:$0xff] }
  0x65   : > { %v504_v45 = vsub.f32 %v2014_v54, %v479_v22  ;;  %v505_v34 = vsub.f32 %v2019_v55, %v480_v51  ;;  %v674_v26 = vsel %vm297_vm5, %v479_v22, 0.0  ;;  %v676_v33 = vsel %vm297_vm5, %v480_v51, 0.0 }
  0x66   : > { %v575_v39 = vadd.f32 %v574_v35, %v573_v30  ;;  %v657_v42 = vadd.f32 %v656_v2, %v655_v18  ;;  %v675_v61 = vadd.f32 %v674_v26, %v673_v24  ;;  %v731_v9 = vmul.f32 %v479_v22, %v479_v22 }
  0x67   : > { %v732_v6 = vmul.f32 %v480_v51, %v480_v51  ;;  %v814_v28 = vmul.f32 %v504_v45, %v504_v45  ;;  %v815_v47 = vmul.f32 %v505_v34, %v505_v34  ;;  %v908_v0 = vpack.c.bf16 %v480_v51, %v479_v22 }
  0x68   : > { %v2553_v23 = vadd.f32 %v576_v50, %v575_v39  ;;  %v659_v54 = vadd.f32 %v658_v3, %v657_v42  ;;  %v677_v49 = vadd.f32 %v676_v33, %v675_v61  ;;  %v757_v55 = vsel %vm297_vm5, %v731_v9, 0.0  ;;  %v2615_v9 = vld [vmem:[%s2173_s12 + $0xb0] sm:$0xff] }
  0x69   : > { %v758_v35 = vadd.f32 %v757_v55, %v756_v10  ;;  %v759_v24 = vsel %vm297_vm5, %v732_v6, 0.0  ;;  %v840_v2 = vsel %vm297_vm5, %v814_v28, 0.0  ;;  %v842_v63 = vsel %vm297_vm5, %v815_v47, 0.0  ;;  %1105 = vxpose.xlu1.c.b16.cont [2/8] (narrow) %v908_v0, 96 }
  0x6a   : > { %3487 = vst [vmem:[#allocation58_spill] sm:$0xff] %v2553_v23  ;;  %v2562_v30 = vadd.f32 %v660_v13, %v659_v54  ;;  %v841_v50 = vadd.f32 %v840_v2, %v839_v11  ;;  %v2567_v3 = vsel %vm3489_vm0, %v2551_v16, 0.0  ;;  %v2572_v10 = vsel %vm3490_vm3, %v2557_v7, 0.0  ;;  %v2583_v11 = vld [vmem:[%s2173_s12 + $0x20] sm:$0xff] }
  0x6b   : > { %v760_v18 = vadd.f32 %v759_v24, %v758_v35  ;;  %v2576_v22 = vsub.f32 %v2049_v5, %v2567_v3  ;;  %v2580_v13 = vsub.f32 %v2054_v8, %v2572_v10  ;;  %v745_v41 = vmul.f32 %v2444_v48, %v2444_v48 }
  0x6c   : > { %3488 = vst [vmem:[#allocation59_spill] sm:$0xff] %v2562_v30  ;;  %v843_v51 = vadd.f32 %v842_v63, %v841_v50  ;;  %v917_v45 = vpack.c.bf16 %v2572_v10, %v2567_v3  ;;  %v2594_v5 = vsel %vm297_vm5, %v2444_v48, 0.0  ;;  %v2598_v8 = vsel %vm297_vm5, %v2374_v27, 0.0 }
  0x6d   : > { %v746_v34 = vmul.f32 %v2374_v27, %v2374_v27  ;;  %v829_v26 = vmul.f32 %v2415_v21, %v2415_v21  ;;  %vm3491_vm0 = vcmp.lt.s32.totalorder %v2024_v57, 200  ;;  %vm3492_vm3 = vcmp.lt.s32.totalorder %v2041_v62, 200  ;;  %v2618_v21 = vld [vmem:[%s2173_s12 + $0xb8] sm:$0xff] }
  0x6e   : > { %1122 = vxpose.xlu0.c.b16.cont [3/5] (short) (narrow) %v917_v45, 96  ;;  %v481_v33 = vsel %vm3491_vm0, %v2583_v11, 0.0  ;;  %v482_v48 = vsel %vm3492_vm3, %v2586_v32, 0.0  ;;  %v2621_v6 = vsel %vm297_vm5, %v745_v41, 0.0  ;;  %v828_v57 = vmul.f32 %v2470_v20, %v2470_v20  ;;  %v2653_v45 = vld [vmem:[%s2173_s12 + $0x38] sm:$0xff] }
  0x6f   : > { %v506_v39 = vsub.f32 %v2072_v36, %v481_v33  ;;  %v507_v42 = vsub.f32 %v2080_v38, %v482_v48  ;;  %v678_v61 = vsel %vm297_vm5, %v481_v33, 0.0  ;;  %v680_v27 = vsel %vm297_vm5, %v482_v48, 0.0 }
  0x70   : > { %v679_v62 = vadd.f32 %v678_v61, %v677_v49  ;;  %v733_v28 = vmul.f32 %v481_v33, %v481_v33  ;;  %v734_v47 = vmul.f32 %v482_v48, %v482_v48  ;;  %v909_v0 = vpack.c.bf16 %v482_v48, %v481_v33 }
  0x71   : > { %v816_v36 = vmul.f32 %v506_v39, %v506_v39  ;;  %v817_v38 = vmul.f32 %v507_v42, %v507_v42  ;;  %vm3493_vm0 = vcmp.lt.s32.totalorder %v2075_v37, 200  ;;  %vm3494_vm3 = vcmp.lt.s32.totalorder %v2105_v59, 200 }
  0x72   : > { %v681_v54 = vadd.f32 %v680_v27, %v679_v62  ;;  %v761_v55 = vsel %vm297_vm5, %v733_v28, 0.0  ;;  %v2629_v35 = vsel %vm3493_vm0, %v2615_v9, 0.0  ;;  %v2634_v20 = vsel %vm3494_vm3, %v2618_v21, 0.0  ;;  %1106 = vxpose.xlu1.c.b16.cont [3/8] (narrow) %v909_v0, 96  ;;  %v2698_v28 = vld [vmem:[%s2173_s12 + $0x40] sm:$0xff] }
  0x73   : > { %v762_v49 = vadd.f32 %v761_v55, %v760_v18  ;;  %v763_v24 = vsel %vm297_vm5, %v734_v47, 0.0  ;;  %v844_v2 = vsel %vm297_vm5, %v816_v36, 0.0  ;;  %v846_v63 = vsel %vm297_vm5, %v817_v38, 0.0  ;;  %v2650_v18 = vld [vmem:[%s2173_s12 + $0x30] sm:$0xff] }
  0x74   : > { %v747_v50 = vmul.f32 %v2505_v25, %v2505_v25  ;;  %v845_v41 = vadd.f32 %v844_v2, %v843_v51  ;;  %v2643_v37 = vsub.f32 %v2114_v4, %v2629_v35  ;;  %v2647_v59 = vsub.f32 %v2141_v31, %v2634_v20 }
  0x75   : > { %v2656_v33 = vsel %vm297_vm5, %v746_v34, 0.0  ;;  %v2659_v48 = vsel %vm297_vm5, %v829_v26, 0.0  ;;  %v2662_v51 = vsel %vm297_vm5, %v828_v57, 0.0  ;;  %v764_v4 = vadd.f32 %v763_v24, %v762_v49 }
  0x76   : > { %v2666_v39 = vsel %vm297_vm5, %v2505_v25, 0.0  ;;  %v2670_v31 = vsel %vm297_vm5, %v2510_v56, 0.0  ;;  %v847_v42 = vadd.f32 %v846_v63, %v845_v41  ;;  %v918_v34 = vpack.c.bf16 %v2634_v20, %v2629_v35 }
  0x77   : > { %v2676_v26 = vmul.f32 %v2510_v56, %v2510_v56  ;;  %v2680_v61 = vmul.f32 %v2515_v29, %v2515_v29  ;;  %vm3495_vm0 = vcmp.lt.s32.totalorder %v2109_v60, 200  ;;  %vm3496_vm3 = vcmp.lt.s32.totalorder %v2129_v14, 200 }
  0x78   : > { %v483_v25 = vsel %vm3495_vm0, %v2650_v18, 0.0  ;;  %v484_v27 = vsel %vm3496_vm3, %v2653_v45, 0.0  ;;  %v2689_v57 = vsel %vm297_vm5, %v747_v50, 0.0  ;;  %v2693_v56 = vmul.f32 %v2519_v15, %v2519_v15  ;;  %1123 = vxpose.xlu0.c.b16.cont [4/5] (short) (narrow) %v918_v34, 96  ;;  %v2703_v15 = vld [vmem:[%s2173_s12 + $0x48] sm:$0xff] }
  0x79   : > { %v508_v29 = vsub.f32 %v2164_v43, %v483_v25  ;;  %v509_v62 = vsub.f32 %v2180_v52, %v484_v27  ;;  %v682_v60 = vsel %vm297_vm5, %v483_v25, 0.0  ;;  %v684_v14 = vsel %vm297_vm5, %v484_v27, 0.0  ;;  %3497 = vst [vmem:[#allocation60_spill] sm:$0xff] %v2703_v15 }
  0x7a   : > { %v735_v47 = vmul.f32 %v483_v25, %v483_v25  ;;  %v736_v36 = vmul.f32 %v484_v27, %v484_v27  ;;  %v683_v38 = vadd.f32 %v682_v60, %v681_v54  ;;  %v910_v49 = vpack.c.bf16 %v484_v27, %v483_v25  ;;  %v3501_v27 = vld [vmem:[#allocation30_spill] sm:$0xff] }
  0x7b   : > { %v818_v0 = vmul.f32 %v508_v29, %v508_v29  ;;  %v819_v55 = vmul.f32 %v509_v62, %v509_v62  ;;  %v2709_v52 = vpack.c.bf16 %v2214_v53, %v2214_v53  ;;  %vm3499_vm0 = vcmp.lt.s32.totalorder %v2205_v58, 200  ;;  %v2723_v62 = vld [vmem:[%s2173_s12 + $0x50] sm:$0xff] }
  0x7c   : > { %v765_v24 = vsel %vm297_vm5, %v735_v47, 0.0  ;;  %v767_v43 = vsel %vm297_vm5, %v736_v36, 0.0  ;;  %v485_v2 = vsel %vm3499_vm0, %v2698_v28, 0.0  ;;  %v685_v54 = vadd.f32 %v684_v14, %v683_v38  ;;  %1107 = vxpose.xlu1.c.b16.cont [4/8] (narrow) %v910_v49, 96  ;;  %3502 = vst [vmem:[#allocation30_spill] sm:$0xff] %v2723_v62  ;;  %v2728_v38 = vld [vmem:[%s2173_s12 + $0x58] sm:$0xff] }
  0x7d   : > { %3498 = vst [vmem:[#allocation61_spill] sm:$0xff] %v2709_v52  ;;  %v766_v63 = vadd.f32 %v765_v24, %v764_v4  ;;  %v848_v50 = vsel %vm297_vm5, %v818_v0, 0.0  ;;  %v850_v41 = vsel %vm297_vm5, %v819_v55, 0.0  ;;  %1124 = vxpose.xlu0.c.b16.end [5/5] (short) (narrow) %v2709_v52, 96  ;;  %vm3500_vm3 = vcmp.lt.s32.totalorder %v2242_v40, 200  ;;  %v3503_v4 = vld [vmem:[#allocation32_spill] sm:$0xff] }
  0x7e   : > { %v849_v34 = vadd.f32 %v848_v50, %v847_v42  ;;  %v486_v25 = vsel %vm3500_vm3, %v2703_v15, 0.0  ;;  %v510_v29 = vsub.f32 %v3501_v27, %v485_v2  ;;  %v686_v58 = vsel %vm297_vm5, %v485_v2, 0.0  ;;  %3504 = vst [vmem:[#allocation32_spill] sm:$0xff] %v2728_v38  ;;  %v3505_v27 = vld [vmem:[#allocation31_spill] sm:$0xff] }
  0x7f   : > { %v768_v60 = vadd.f32 %v767_v43, %v766_v63  ;;  %v511_v14 = vsub.f32 %v3503_v4, %v486_v25  ;;  %v687_v47 = vadd.f32 %v686_v58, %v685_v54  ;;  %v688_v36 = vsel %vm297_vm5, %v486_v25, 0.0  ;;  %v3507_v58 = vld [vmem:[#allocation35_spill] sm:$0xff] }
  0x80   : > { %v851_v42 = vadd.f32 %v850_v41, %v849_v34  ;;  %v737_v0 = vmul.f32 %v485_v2, %v485_v2  ;;  %v738_v55 = vmul.f32 %v486_v25, %v486_v25  ;;  %v820_v49 = vmul.f32 %v510_v29, %v510_v29  ;;  %v2745_v52 = vld [vmem:[%s2173_s12 + $0x60] sm:$0xff] }
  0x81   : > { %v689_v40 = vadd.f32 %v688_v36, %v687_v47  ;;  %v821_v24 = vmul.f32 %v511_v14, %v511_v14  ;;  %v911_v50 = vpack.c.bf16 %v486_v25, %v485_v2  ;;  %vm3506_vm0 = vcmp.lt.s32.totalorder %v3505_v27, 200  ;;  %v3509_v25 = vld [vmem:[#allocation37_spill] sm:$0xff]  ;;  %v3510_v14 = vld [vmem:[#allocation38_spill] sm:$0xff] }
  0x82   : > { %v487_v30 = vsel %vm3506_vm0, %v2723_v62, 0.0  ;;  %v769_v43 = vsel %vm297_vm5, %v737_v0, 0.0  ;;  %v771_v63 = vsel %vm297_vm5, %v738_v55, 0.0  ;;  %v852_v54 = vsel %vm297_vm5, %v820_v49, 0.0  ;;  %v3512_v62 = vld [vmem:[#allocation13_spill] sm:$0xff] }
  0x83   : > { %vm3508_vm3 = vcmp.lt.s32.totalorder %v3507_v58, 200  ;;  %v770_v34 = vadd.f32 %v769_v43, %v768_v60  ;;  %v854_v29 = vsel %vm297_vm5, %v821_v24, 0.0  ;;  %1108 = vxpose.xlu1.c.b16.cont [5/8] (narrow) %v911_v50, 96  ;;  %v853_v2 = vadd.f32 %v852_v54, %v851_v42  ;;  %v2748_v60 = vld [vmem:[%s2173_s12 + $0x68] sm:$0xff] }
  0x84   : > { %v488_v41 = vsel %vm3508_vm3, %v2728_v38, 0.0  ;;  %v512_v4 = vsub.f32 %v3509_v25, %v487_v30  ;;  %v690_v36 = vsel %vm297_vm5, %v487_v30, 0.0  ;;  %v739_v55 = vmul.f32 %v487_v30, %v487_v30  ;;  %v3511_v38 = vld [vmem:[#allocation12_spill] sm:$0xff] }
  0x85   : > { %v513_v47 = vsub.f32 %v3510_v14, %v488_v41  ;;  %v692_v0 = vsel %vm297_vm5, %v488_v41, 0.0  ;;  %v772_v49 = vadd.f32 %v771_v63, %v770_v34  ;;  %v855_v27 = vadd.f32 %v854_v29, %v853_v2  ;;  %v3514_v2 = vld [vmem:[#allocation44_spill] sm:$0xff] }
  0x86   : > { %v691_v23 = vadd.f32 %v690_v36, %v689_v40  ;;  %v740_v58 = vmul.f32 %v488_v41, %v488_v41  ;;  %v773_v24 = vsel %vm297_vm5, %v739_v55, 0.0  ;;  %v822_v42 = vmul.f32 %v512_v4, %v512_v4 }
  0x87   : > { %v823_v50 = vmul.f32 %v513_v47, %v513_v47  ;;  %v912_v43 = vpack.c.bf16 %v488_v41, %v487_v30  ;;  %v774_v25 = vadd.f32 %v773_v24, %v772_v49  ;;  %v1467_v15 = vpack.c.bf16 %v3512_v62, %v3511_v38  ;;  %v3517_v62 = vld [vmem:[#allocation47_spill] sm:$0xff]  ;;  %v3518_v47 = vld [vmem:[#allocation49_spill] sm:$0xff] }
  0x88   : > { %v693_v54 = vadd.f32 %v692_v0, %v691_v23  ;;  %v775_v14 = vsel %vm297_vm5, %v740_v58, 0.0  ;;  %v856_v63 = vsel %vm297_vm5, %v822_v42, 0.0  ;;  %v489_v29 = vsel %vm439_vm10, %v2745_v52, 0.0 }
  0x89   : > { %v858_v40 = vsel %vm297_vm5, %v823_v50, 0.0  ;;  %1109 = vxpose.xlu1.c.b16.cont [6/8] (narrow) %v912_v43, 96  ;;  %vm3515_vm0 = vcmp.lt.s32.totalorder %v3514_v2, 200  ;;  %v776_v23 = vadd.f32 %v775_v14, %v774_v25  ;;  %v857_v41 = vadd.f32 %v856_v63, %v855_v27  ;;  %1468 = vmatpush1.bf16.msk.msra.mxu0 %vm1911_vm2, %v1467_v15  ;;  %v2778_v27 = vld [vmem:[%s2173_s12 + $0x70] sm:$0xff]  ;;  %v2781_v14 = vld [vmem:[%s2173_s12 + $0x78] sm:$0xff]  ;;  %v3526_v2 = vld [vmem:[#allocation15_spill] sm:$0xff] }
  0x8a   : > { %v490_v30 = vsel %vm3515_vm0, %v2748_v60, 0.0  ;;  %v514_v38 = vsub.f32 %v3517_v62, %v489_v29  ;;  %v3519_v0 = vmov 0   ;;  %v694_v55 = vsel %vm297_vm5, %v489_v29, 0.0  ;;  %3524 = vst [vmem:[#allocation31_spill] sm:$0xff] %v2781_v14  ;;  %s1776_s12 = smov [#allocation2]  }
  0x8b   : > { %v515_v36 = vsub.f32 %v3518_v47, %v490_v30  ;;  %989 = vmatprep.subr.bf16.mxu0 %v3519_v0  ;;  %v696_v49 = vsel %vm297_vm5, %v490_v30, 0.0  ;;  %v741_v58 = vmul.f32 %v489_v29, %v489_v29  ;;  %v742_v24 = vmul.f32 %v490_v30, %v490_v30  ;;  %s1638_s14 = sshll.u32 %s1776_s12, 4  ;;  %s1639_s14 = int_to_ptr.vmem [resolvable:$false] %s1638_s14 }
  0x8c   : > { %v859_v42 = vadd.f32 %v858_v40, %v857_v41  ;;  %v695_v50 = vadd.f32 %v694_v55, %v693_v54  ;;  %v824_v43 = vmul.f32 %v514_v38, %v514_v38  ;;  %vm3520_vm10 = vcmp.lt.s32.totalorder %v1905_v17, 200  ;;  %v3525_v54 = vld [vmem:[#allocation14_spill] sm:$0xff]  ;;  %s1640_s29 = scalar_lea.vmem %s1639_s14, 256 }
  0x8d   : > { %v825_v25 = vmul.f32 %v515_v36, %v515_v36  ;;  %vm3521_vm3 = vcmp.lt.s32.totalorder %v1919_v19, 200  ;;  %v777_v63 = vsel %vm297_vm5, %v741_v58, 0.0  ;;  %v779_v34 = vsel %vm297_vm5, %v742_v24, 0.0  ;;  %v3530_v58 = vld [vmem:[#allocation17_spill] sm:$0xff] }
  0x8e   : > { %vm2773_vm0 = vmpackc.low %vm3521_vm3, %vm3520_vm10  ;;  %v913_v40 = vpack.c.bf16 %v490_v30, %v489_v29  ;;  %v1470_v41 = vpack.c.bf16 %v3526_v2, %v3525_v54  ;;  %v697_v62 = vadd.f32 %v696_v49, %v695_v50  ;;  %v778_v17 = vadd.f32 %v777_v63, %v776_v23  ;;  %v3528_v29 = vld [vmem:[#allocation46_spill] sm:$0xff]  ;;  %v3532_v50 = vld [vmem:[#allocation52_spill] sm:$0xff] }
  0x8f   : > { %v860_v19 = vsel %vm297_vm5, %v824_v43, 0.0  ;;  %v862_v38 = vsel %vm297_vm5, %v825_v25, 0.0  ;;  %v491_v55 = vsel %vm441_vm1, %v2778_v27, 0.0  ;;  %vm3529_vm10 = vcmp.lt.s32.totalorder %v3528_v29, 200  ;;  %v3531_v49 = vld [vmem:[#allocation18_spill] sm:$0xff] }
  0x90   : > { %1110 = vxpose.xlu1.c.b16.cont [7/8] (narrow) %v913_v40, 96  ;;  %v861_v47 = vadd.f32 %v860_v19, %v859_v42  ;;  %1471 = vmatpush1.bf16.msk.msra.mxu0 %vm2773_vm0, %v1470_v41  ;;  %v492_v30 = vsel %vm3529_vm10, %v2781_v14, 0.0  ;;  %v1473_v23 = vpack.c.bf16 %v3531_v49, %v3530_v58  ;;  %v780_v24 = vadd.f32 %v779_v34, %v778_v17  ;;  %v3533_v42 = vld [vmem:[#allocation54_spill] sm:$0xff] }
  0x91   : > { %991 = vmatprep.subr.bf16.mxu0 %v3519_v0  ;;  %v516_v43 = vsub.f32 %v3532_v50, %v491_v55  ;;  %v517_v25 = vsub.f32 %v3533_v42, %v492_v30  ;;  %v698_v63 = vsel %vm297_vm5, %v491_v55, 0.0  ;;  %v700_v2 = vsel %vm297_vm5, %v492_v30, 0.0  ;;  %v3535_v50 = vld [vmem:[#allocation21_spill] sm:$0xff] }
  0x92   : > { %v863_v40 = vadd.f32 %v862_v38, %v861_v47  ;;  %v699_v54 = vadd.f32 %v698_v63, %v697_v62  ;;  %v743_v41 = vmul.f32 %v491_v55, %v491_v55  ;;  %v744_v19 = vmul.f32 %v492_v30, %v492_v30  ;;  %v3536_v38 = vld [vmem:[#allocation23_spill] sm:$0xff] }
  0x93   : > { %v826_v36 = vmul.f32 %v516_v43, %v516_v43  ;;  %v827_v29 = vmul.f32 %v517_v25, %v517_v25  ;;  %v914_v14 = vpack.c.bf16 %v492_v30, %v491_v55  ;;  %v2806_v34 = vsel %vm297_vm5, %v2676_v26, 0.0 }
  0x94   : > { %v701_v17 = vadd.f32 %v700_v2, %v699_v54  ;;  %v781_v58 = vsel %vm297_vm5, %v743_v41, 0.0  ;;  %1474 = vmatpush1.bf16.msk.msra.mxu0 %vm2092_vm15, %v1473_v23  ;;  %v1476_v62 = vpack.c.bf16 %v3536_v38, %v3535_v50  ;;  %v783_v43 = vsel %vm297_vm5, %v744_v19, 0.0  ;;  %v3537_v2 = vld [vmem:[#allocation56_spill] sm:$0xff] }
  0x95   : > { %v782_v47 = vadd.f32 %v781_v58, %v780_v24  ;;  %v864_v55 = vsel %vm297_vm5, %v826_v36, 0.0  ;;  %v866_v26 = vsel %vm297_vm5, %v827_v29, 0.0  ;;  %1111 = vxpose.xlu1.c.b16.end [8/8] (narrow) %v914_v14, 96  ;;  %993 = vmatprep.subr.bf16.mxu0 %v3519_v0  ;;  %v872_v30 = vsel %vm297_vm5, %v2680_v61, 0.0  ;;  %v3538_v14 = vld [vmem:[#allocation57_spill] sm:$0xff] }
  0x96   : > { %v749_v23 = vmul.f32 %v2567_v3, %v2567_v3  ;;  %v703_v42 = vadd.f32 %v2594_v5, %v701_v17  ;;  %v865_v25 = vadd.f32 %v864_v55, %v863_v40  ;;  %v750_v24 = vmul.f32 %v2572_v10, %v2572_v10  ;;  %v3540_v5 = vld [vmem:[#allocation27_spill] sm:$0xff]  ;;  %v3541_v40 = vld [vmem:[#allocation29_spill] sm:$0xff] }
  0x97   : > { %v832_v63 = vmul.f32 %v2576_v22, %v2576_v22  ;;  %v784_v54 = vadd.f32 %v783_v43, %v782_v47  ;;  %v1509_v41 = vpack.c.bf16 %v3538_v14, %v3537_v2  ;;  %v833_v61 = vmul.f32 %v2580_v13, %v2580_v13  ;;  %v3546_v14 = vld [vmem:[#allocation40_spill] sm:$0xff] }
  0x98   : > { %v705_v19 = vadd.f32 %v2598_v8, %v703_v42  ;;  %v867_v36 = vadd.f32 %v866_v26, %v865_v25  ;;  %1477 = vmatpush1.bf16.msk.msra.mxu0 %vm2191_vm9, %v1476_v62  ;;  %v1479_v17 = vpack.c.bf16 %v3541_v40, %v3540_v5  ;;  %v874_v22 = vsel %vm297_vm5, %v2693_v56, 0.0  ;;  %v956_v8 = vpop.trf.xlu0 }
  0x99   : > { %v710_v58 = vsel %vm297_vm5, %v2567_v3, 0.0  ;;  %v786_v50 = vadd.f32 %v2621_v6, %v784_v54  ;;  %995 = vmatprep.subr.bf16.mxu0 %v3519_v0  ;;  %1510 = vmatpush1.bf16.msk.msra.mxu1 %vm1911_vm2, %v1509_v41  ;;  %v1512_v13 = vpack.c.bf16 %v2531_v44, %v2528_v1  ;;  %v712_v38 = vsel %vm297_vm5, %v2572_v10, 0.0  ;;  %v3547_v41 = vld [vmem:[#allocation43_spill] sm:$0xff] }
  0x9a   : > { %v793_v62 = vsel %vm297_vm5, %v749_v23, 0.0  ;;  %v707_v56 = vadd.f32 %v2666_v39, %v705_v19  ;;  %v869_v3 = vadd.f32 %v2662_v51, %v867_v36  ;;  %1159 = vmatprep.subr.bf16.mxu1 %v3519_v0  ;;  %v795_v6 = vsel %vm297_vm5, %v750_v24, 0.0  ;;  %v3543_v51 = vld [vmem:[#allocation33_spill] sm:$0xff]  ;;  %v3544_v39 = vld [vmem:[#allocation34_spill] sm:$0xff] }
  0x9b   : > { %v876_v4 = vsel %vm297_vm5, %v832_v63, 0.0  ;;  %v788_v47 = vadd.f32 %v2656_v33, %v786_v50  ;;  %vm964_vm1 = vcmask 588800   ;;  %v878_v1 = vsel %vm297_vm5, %v833_v61, 0.0 }
  0x9c   : > { %v709_v44 = vadd.f32 %v2670_v31, %v707_v56  ;;  %v871_v10 = vadd.f32 %v2659_v48, %v869_v3  ;;  %1480 = vmatpush1.bf16.msk.msra.mxu0 %vm2290_vm7, %v1479_v17  ;;  %v1482_v55 = vpack.c.bf16 %v3544_v39, %v3543_v51  ;;  %1502 = vmatprep.mubr.msk.bf16.mxu0 %vm964_vm1, %v956_v8  ;;  %v3550_v8 = vld [vmem:[#allocation48_spill] sm:$0xff]  ;;  %vm983_vm2 = vcmask 1043456  }
  0x9d   : > { %v751_v26 = vmul.f32 %v2629_v35, %v2629_v35  ;;  %v790_v33 = vadd.f32 %v2689_v57, %v788_v47  ;;  %997 = vmatprep.subr.bf16.mxu0 %v3519_v0  ;;  %1513 = vmatpush1.bf16.msk.msra.mxu1 %vm2773_vm0, %v1512_v13  ;;  %v1515_v48 = vpack.c.bf16 %v2586_v32, %v2583_v11  ;;  %v1775_v11 = vmov 0.0  }
  0x9e   : > { %v711_v31 = vadd.f32 %v710_v58, %v709_v44  ;;  %v873_v23 = vadd.f32 %v872_v30, %v871_v10  ;;  %1161 = vmatprep.subr.bf16.mxu1 %v3519_v0  ;;  %v1536_v42 = vpack.c.bf16 %v2494_v12, %v2488_v46  ;;  %v1539_v25 = vpack.c.bf16 %v2557_v7, %v2551_v16  ;;  %v3567_v12 = vld [vmem:[#allocation61_spill] sm:$0xff] }
  0x9f   : > { %299 = vst.msk [vmem:[%s2881_s24] sm:$0xff] %vm297_vm5, %v1775_v11  ;;  %300 = vst.msk [vmem:[%s2881_s24 + $0x8] sm:$0xff] %vm297_vm5, %v1775_v11  ;;  %v714_v32 = vsel %vm297_vm5, %v2629_v35, 0.0  ;;  %v834_v57 = vmul.f32 %v2643_v37, %v2643_v37  ;;  %v792_v15 = vadd.f32 %v2806_v34, %v790_v33  ;;  %v1542_v30 = vpack.c.bf16 %v2618_v21, %v2615_v9 }
  0xa0   : > { %301 = vst.msk [vmem:[%s2881_s24 + $0x10] sm:$0xff] %vm297_vm5, %v1775_v11  ;;  %302 = vst.msk [vmem:[%s2881_s24 + $0x18] sm:$0xff] %vm297_vm5, %v1775_v11  ;;  %v752_v24 = vmul.f32 %v2634_v20, %v2634_v20  ;;  %v713_v63 = vadd.f32 %v712_v38, %v711_v31  ;;  %v875_v54 = vadd.f32 %v874_v22, %v873_v23  ;;  %1483 = vmatpush1.bf16.msk.msra.mxu0 %vm2319_vm14, %v1482_v55  ;;  %v3551_v38 = vld [vmem:[#allocation50_spill] sm:$0xff]  ;;  %v3555_v55 = vld [vmem:[#allocation32_spill] sm:$0xff] }
  0xa1   : > { %303 = vst.msk [vmem:[%s2881_s24 + $0x20] sm:$0xff] %vm297_vm5, %v1775_v11  ;;  %304 = vst.msk [vmem:[%s2881_s24 + $0x28] sm:$0xff] %vm297_vm5, %v1775_v11  ;;  %v1485_v61 = vpack.c.bf16 %v3547_v41, %v3546_v14  ;;  %v716_v35 = vsel %vm297_vm5, %v2634_v20, 0.0  ;;  %v835_v37 = vmul.f32 %v2647_v59, %v2647_v59  ;;  %v794_v34 = vadd.f32 %v793_v62, %v792_v15  ;;  %v3548_v59 = vld [vmem:[#allocation28_spill] sm:$0xff]  ;;  %v3557_v31 = vld [vmem:[#allocation10_spill] sm:$0xff] }
  0xa2   : > { %305 = vst.msk [vmem:[%s2881_s24 + $0x30] sm:$0xff] %vm297_vm5, %v1775_v11  ;;  %306 = vst.msk [vmem:[%s2881_s24 + $0x38] sm:$0xff] %vm297_vm5, %v1775_v11  ;;  %999 = vmatprep.subr.bf16.mxu0 %v3519_v0  ;;  %1516 = vmatpush1.bf16.msk.msra.mxu1 %vm2092_vm15, %v1515_v48  ;;  %v1518_v19 = vpack.c.bf16 %v2653_v45, %v2650_v18  ;;  %v753_v36 = vmul.f32 %v2214_v53, %v2214_v53  ;;  %v797_v5 = vsel %vm297_vm5, %v751_v26, 0.0  ;;  %v3556_v48 = vld [vmem:[#allocation11_spill] sm:$0xff]  ;;  %v1629_v15 = vld [vmem:[%s1927_s9 + $0x98] sm:$0xff] }
  0xa3   : > { %307 = vst.msk [vmem:[%s2881_s24 + $0x40] sm:$0xff] %vm297_vm5, %v1775_v11  ;;  %308 = vst.msk [vmem:[%s2881_s24 + $0x48] sm:$0xff] %vm297_vm5, %v1775_v11  ;;  %v715_v40 = vadd.f32 %v714_v32, %v713_v63  ;;  %v877_v17 = vadd.f32 %v876_v4, %v875_v54  ;;  %1163 = vmatprep.subr.bf16.mxu1 %v3519_v0  ;;  %v718_v20 = vsel %vm297_vm5, %v2214_v53, 0.0  ;;  %v880_v49 = vsel %vm297_vm5, %v834_v57, 0.0  ;;  %v3552_v53 = vld [vmem:[#allocation60_spill] sm:$0xff]  ;;  %v1628_v57 = vld [vmem:[%s1927_s9 + $0x90] sm:$0xff] }
  0xa4   : > { %309 = vst.msk [vmem:[%s2881_s24 + $0x50] sm:$0xff] %vm297_vm5, %v1775_v11  ;;  %310 = vst.msk [vmem:[%s2881_s24 + $0x58] sm:$0xff] %vm297_vm5, %v1775_v11  ;;  %v836_v22 = vmul.f32 %v3548_v59, %v3548_v59  ;;  %v796_v58 = vadd.f32 %v795_v6, %v794_v34  ;;  %v799_v18 = vsel %vm297_vm5, %v752_v24, 0.0  ;;  %1486 = vmatpush1.bf16.msk.msra.mxu0 %vm2393_vm4, %v1485_v61  ;;  %v882_v56 = vsel %vm297_vm5, %v835_v37, 0.0  ;;  %v1630_v54 = vld [vmem:[%s1927_s9 + $0xa0] sm:$0xff]  ;;  %v1631_v14 = vld [vmem:[%s1927_s9 + $0xa8] sm:$0xff] }
  0xa5   : > { %v717_v45 = vadd.f32 %v716_v35, %v715_v40  ;;  %v879_v50 = vadd.f32 %v878_v1, %v877_v17  ;;  %v1488_v62 = vpack.c.bf16 %v3551_v38, %v3550_v8  ;;  %1001 = vmatprep.subr.bf16.mxu0 %v3519_v0  ;;  %v1521_v6 = vpack.c.bf16 %v3552_v53, %v2698_v28  ;;  %v3554_v28 = vld [vmem:[#allocation30_spill] sm:$0xff]  ;;  %v3561_v61 = vld [vmem:[#allocation31_spill] sm:$0xff]  ;;  %v3563_v34 = vld [vmem:[#allocation53_spill] sm:$0xff]  ;;  %v957_v17 = vpop.trf.xlu0 }
  0xa6   : > { %v798_v3 = vadd.f32 %v797_v5, %v796_v58  ;;  %1519 = vmatpush1.bf16.msk.msra.mxu1 %vm2191_vm9, %v1518_v19  ;;  %v801_v4 = vsel %vm297_vm5, %v753_v36, 0.0  ;;  %v884_v44 = vsel %vm297_vm5, %v836_v22, 0.0  ;;  %v1524_v26 = vpack.c.bf16 %v3555_v55, %v3554_v28  ;;  %v3564_v19 = vld [vmem:[#allocation42_spill] sm:$0xff]  ;;  %311 = vst.msk [vmem:[%s3052_s26] sm:$0xff] %vm297_vm5, %v1775_v11  ;;  %312 = vst.msk [vmem:[%s3052_s26 + $0x8] sm:$0xff] %vm297_vm5, %v1775_v11 }
  0xa7   : > { %v2962_v47 = vadd.f32 %v718_v20, %v717_v45  ;;  %v881_v1 = vadd.f32 %v880_v49, %v879_v50  ;;  %1165 = vmatprep.subr.bf16.mxu1 %v3519_v0  ;;  %v3558_v23 = vpack.c.bf16 %v3556_v48, %v3557_v31  ;;  %v1494_v24 = vpack.c.bf16 %v1629_v15, %v1628_v57  ;;  %v3566_v5 = vld [vmem:[#allocation26_spill] sm:$0xff]  ;;  %v940_v20 = vpop.trf.xlu1 }
  0xa8   : > { %v800_v10 = vadd.f32 %v799_v18, %v798_v3  ;;  %1489 = vmatpush1.bf16.msk.msra.mxu0 %vm2427_vm6, %v1488_v62  ;;  %v1527_v43 = vpack.c.bf16 %v2748_v60, %v2745_v52  ;;  %v1497_v41 = vpack.c.bf16 %v1631_v14, %v1630_v54  ;;  %v1530_v2 = vpack.c.bf16 %v3561_v61, %v2778_v27  ;;  %v1632_v52 = vld [vmem:[%s1927_s9 + $0xb0] sm:$0xff]  ;;  %v1633_v60 = vld [vmem:[%s1927_s9 + $0xb8] sm:$0xff]  ;;  %s1286_s9 = sshll.u32 %s3101_s30, 4  ;;  %s1287_s9 = int_to_ptr.vmem [resolvable:$true] %s1286_s9 }
  0xa9   : > { %v883_v51 = vadd.f32 %v882_v56, %v881_v1  ;;  %1003 = vmatprep.subr.bf16.mxu0 %v3519_v0  ;;  %v1500_v37 = vpack.c.bf16 %v1633_v60, %v1632_v52  ;;  %v1533_v36 = vpack.c.bf16 %v3564_v19, %v3563_v34  ;;  %v985_v40 = vsel %vm983_vm2, %v3566_v5, 0  ;;  %v958_v59 = vpop.trf.xlu0  ;;  %313 = vst.msk [vmem:[%s3052_s26 + $0x10] sm:$0xff] %vm297_vm5, %v1775_v11  ;;  %v3568_v53 = vld [vmem:[#allocation58_spill] sm:$0xff]  ;;  %s1634_s11 = scalar_lea.vmem %s1287_s9, 128  ;;  %p1641_p2 = scmp.lt.s32.totalorder %s1287_s9, %s1639_s14 }
  0xaa   : > { %v2968_v29 = vadd.f32 %v801_v4, %v800_v10  ;;  %1522 = vmatpush1.bf16.msk.msra.mxu1 %vm2290_vm7, %v1521_v6  ;;  %v1155_v46 = vsel %vm983_vm2, %v3567_v12, 0  ;;  %314 = vst.msk [vmem:[%s3052_s26 + $0x18] sm:$0xff] %vm297_vm5, %v1775_v11  ;;  %315 = vst.msk [vmem:[%s3052_s26 + $0x20] sm:$0xff] %vm297_vm5, %v1775_v11  ;;  %v578_v6 = vrot.slane %v3568_v53, 4  ;;  %v3569_v4 = vld [vmem:[#allocation59_spill] sm:$0xff]  ;;  %p1635_p13 = scmp.ne.s32.totalorder %s1287_s9, %s1634_s11  ;;  %p1642_p3 = scmp.lt.s32.totalorder %s1640_s29, %s1634_s11 }
  0xab   : > { %v2975_v33 = vadd.f32 %v884_v44, %v883_v51  ;;  %1167 = vmatprep.subr.bf16.mxu1 %v3519_v0  ;;  %v941_v22 = vpop.trf.xlu1  ;;  %316 = vst.msk [vmem:[%s3052_s26 + $0x28] sm:$0xff] %vm297_vm5, %v1775_v11  ;;  %317 = vst.msk [vmem:[%s3052_s26 + $0x30] sm:$0xff] %vm297_vm5, %v1775_v11  ;;  %v662_v1 = vrot.slane %v3569_v4, 4  ;;  %v720_v44 = vrot.slane %v2962_v47, 4 }
  0xac   : > { %1492 = vmatpush1.bf16.msk.msra.mxu0 %vm2030_vm12, %v3558_v23  ;;  %318 = vst.msk [vmem:[%s3052_s26 + $0x38] sm:$0xff] %vm297_vm5, %v1775_v11  ;;  %319 = vst.msk [vmem:[%s3052_s26 + $0x40] sm:$0xff] %vm297_vm5, %v1775_v11  ;;  %v579_v10 = vadd.f32 %v578_v6, %v3568_v53  ;;  %v803_v51 = vrot.slane %v2968_v29, 4  ;;  %p1636_p0 = pnand %p1635_p13, %p1848_p4  ;;  %p1643_p5 = por %p1642_p3, %p1641_p2 }
  0xad   : > { %1005 = vmatprep.subr.bf16.mxu0 %v3519_v0  ;;  %v959_v49 = vpop.trf.xlu0  ;;  %320 = vst.msk [vmem:[%s3052_s26 + $0x48] sm:$0xff] %vm297_vm5, %v1775_v11  ;;  %321 = vst.msk [vmem:[%s3052_s26 + $0x50] sm:$0xff] %vm297_vm5, %v1775_v11  ;;  %v886_v39 = vrot.slane %v2975_v33, 4  ;;  %v663_v28 = vadd.f32 %v662_v1, %v3569_v4  ;;  %v721_v55 = vadd.f32 %v720_v44, %v2962_v47 }
  0xae   : > { %1525 = vmatpush1.bf16.msk.msra.mxu1 %vm2319_vm14, %v1524_v26  ;;  %322 = vst.msk [vmem:[%s3052_s26 + $0x58] sm:$0xff] %vm297_vm5, %v1775_v11  ;;  %v580_v26 = vrot.slane %v579_v10, 2  ;;  %v804_v48 = vadd.f32 %v803_v51, %v2968_v29  ;;  %298 = vst.msk [vmem:[%s3101_s30] sm:$0xff] %vm297_vm5, %v1775_v11  ;;  %p1637_p1 = pneg %p1636_p0 }
  0xaf   : > { %1169 = vmatprep.subr.bf16.mxu1 %v3519_v0  ;;  %v942_v16 = vpop.trf.xlu1  ;;  %v887_v31 = vadd.f32 %v886_v39, %v2975_v33  ;;  %v664_v23 = vrot.slane %v663_v28, 2  ;;  %v722_v32 = vrot.slane %v721_v55, 2 }
  0xb0   : > { %1495 = vmatpush1.bf16.msk.msra.mxu0 %vm2120_vm13, %v1494_v24  ;;  %v581_v57 = vadd.f32 %v580_v26, %v579_v10  ;;  %v805_v15 = vrot.slane %v804_v48, 2  ;;  %p1644_p6 = pnand %p1643_p5, %p1637_p1 }
  0xb1   : > { %1007 = vmatprep.subr.bf16.mxu0 %v3519_v0  ;;  %v960_v7 = vpop.trf.xlu0  ;;  %v888_v24 = vrot.slane %v887_v31, 2  ;;  %v723_v63 = vadd.f32 %v722_v32, %v721_v55 }
  0xb2   : > { %1528 = vmatpush1.bf16.msk.msra.mxu1 %vm2393_vm4, %v1527_v43  ;;  %v665_v43 = vadd.f32 %v664_v23, %v663_v28  ;;  %v582_v47 = vrot.slane %v581_v57, 1  ;;  %v806_v29 = vadd.f32 %v805_v15, %v804_v48 }
  0xb3   : > { %1171 = vmatprep.subr.bf16.mxu1 %v3519_v0  ;;  %v889_v33 = vadd.f32 %v888_v24, %v887_v31  ;;  %v724_v14 = vrot.slane %v723_v63, 1 }
  0xb4   : > { %1498 = vmatpush1.bf16.msk.msra.mxu0 %vm2135_vm8, %v1497_v41  ;;  %v666_v54 = vrot.slane %v665_v43, 1  ;;  %v807_v41 = vrot.slane %v806_v29, 1 }
  0xb5   : > { %1009 = vmatprep.subr.bf16.mxu0 %v3519_v0  ;;  %v890_v61 = vrot.slane %v889_v33, 1  ;;  %v725_v52 = vadd.f32 %v724_v14, %v723_v63  ;;  %v587_v11 = vld [vmem:[%s3101_s30 + $0x1] sm:$0x1]  ;;  %v670_v27 = vld [vmem:[%s3101_s30 + $0x2] sm:$0x1] }
  0xb6   : > { %1531 = vmatpush1.bf16.msk.msra.mxu1 %vm2427_vm6, %v1530_v2  ;;  %v583_v2 = vadd.f32 %v582_v47, %v581_v57  ;;  %v667_v35 = vadd.f32 %v666_v54, %v665_v43  ;;  %v808_v60 = vadd.f32 %v807_v41, %v806_v29  ;;  %v728_v5 = vld [vmem:[%s3101_s30 + $0x3] sm:$0x1]  ;;  %vm585_vm6 = vcmask 778240  }
  0xb7   : > { %1173 = vmatprep.subr.bf16.mxu1 %v3519_v0  ;;  %v891_v34 = vadd.f32 %v890_v61, %v889_v33 }
  0xb8   : > { %1501 = vmatpush1.bf16.msk.msra.mxu0 %vm2152_vm11, %v1500_v37  ;;  %v527_v37 = vld [vmem:[%s3101_s30] sm:$0x1] }
  0xb9   : > { %1011 = vmatprep.subr.bf16.mxu0 %v3519_v0  ;;  %v584_v19 = vadd.f32 %v583_v2, %v527_v37 }
  0xba   : > { %1534 = vmatpush1.bf16.msk.msra.mxu1 %vm2030_vm12, %v1533_v36  ;;  %v668_v36 = vadd.f32 %v667_v35, %v587_v11 }
  0xbb   : > { %1175 = vmatprep.subr.bf16.mxu1 %v3519_v0  ;;  %586 = vst.msk [vmem:[%s3101_s30] sm:$0x1] %vm585_vm6, %v584_v19 }
  0xbc   : > { %1012 = vmatpush1.bf16.msra.mxu0 %v985_v40  ;;  %v726_v40 = vadd.f32 %v725_v52, %v670_v27  ;;  %669 = vst.msk [vmem:[%s3101_s30 + $0x1] sm:$0x1] %vm585_vm6, %v668_v36 }
  0xbe   : > { %1537 = vmatpush1.bf16.msk.msra.mxu1 %vm2120_vm13, %v1536_v42  ;;  %v943_v42 = vpop.trf.xlu1  ;;  %727 = vst.msk [vmem:[%s3101_s30 + $0x2] sm:$0x1] %vm585_vm6, %v726_v40 }
  0xbf   : > { %1177 = vmatprep.subr.bf16.mxu1 %v3519_v0  ;;  %1020 = vmatmul.mubr.bf16.vlgmr.msra.gmra.mrb[0].mxu0 %v940_v20  ;;  %v811_v20 = vld [vmem:[%s3101_s30 + $0x4] sm:$0x1] }
  0xc0   : > { %1503 = vmatprep.mubr.msk.bf16.mxu0 %vm964_vm1, %v957_v17  ;;  %v809_v17 = vadd.f32 %v808_v60, %v728_v5 }
  0xc2   : > { %1540 = vmatpush1.bf16.msk.msra.mxu1 %vm2135_vm8, %v1539_v25  ;;  %v961_v25 = vpop.trf.xlu0  ;;  %v944_v9 = vpop.trf.xlu1  ;;  %810 = vst.msk [vmem:[%s3101_s30 + $0x3] sm:$0x1] %vm585_vm6, %v809_v17 }
  0xc3   : > { %1179 = vmatprep.subr.bf16.mxu1 %v3519_v0 }
  0xc6   : > { %1543 = vmatpush1.bf16.msk.msra.mxu1 %vm2152_vm11, %v1542_v30 }
  0xc7   : > { %1181 = vmatprep.subr.bf16.mxu1 %v3519_v0  ;;  %1028 = vmatmul.mubr.bf16.gmra.mrb[4].mxu0 %v941_v22  ;;  %v945_v0 = vpop.trf.xlu1 }
  0xc8   : > { %1504 = vmatprep.mubr.msk.bf16.mxu0 %vm964_vm1, %v958_v59  ;;  %v892_v59 = vadd.f32 %v891_v34, %v811_v20 }
  0xca   : > { %1182 = vmatpush1.bf16.msra.mxu1 %v1155_v46  ;;  %893 = vst.msk [vmem:[%s3101_s30 + $0x4] sm:$0x1] %vm585_vm6, %v892_v59 }
  0xcf   : > { %1036 = vmatmul.mubr.bf16.gmra.mrb[8].mxu0 %v942_v16 }
  0xd0   : > { %1505 = vmatprep.mubr.msk.bf16.mxu0 %vm964_vm1, %v959_v49 }
  0xd3   : > { %v1128_v21 = vpop.trf.xlu0 }
  0xd4   : > { %1544 = vmatprep.mubr.msk.bf16.mxu1 %vm964_vm1, %v1128_v21 }
  0xd7   : > { %1044 = vmatmul.mubr.bf16.gmra.mrb[12].mxu0 %v943_v42  ;;  %v1129_v30 = vpop.trf.xlu0 }
  0xd8   : > { %1506 = vmatprep.mubr.msk.bf16.mxu0 %vm964_vm1, %v960_v7 }
  0xdb   : > { %v1130_v45 = vpop.trf.xlu0 }
  0xdf   : > { %v1112_v58 = vpop.trf.xlu1  ;;  %1052 = vmatmul.mubr.bf16.gmra.mrb[16].mxu0 %v944_v9  ;;  %v1131_v13 = vpop.trf.xlu0 }
  0xe0   : > { %1190 = vmatmul.mubr.bf16.vlgmr.msra.gmra.mrb[0].mxu1 %v1112_v58  ;;  %1507 = vmatprep.mubr.msk.bf16.mxu0 %vm964_vm1, %v961_v25 }
  0xe1   : > { %1545 = vmatprep.mubr.msk.bf16.mxu1 %vm964_vm1, %v1129_v30 }
  0xe3   : > { %v1113_v18 = vpop.trf.xlu1  ;;  %v1132_v38 = vpop.trf.xlu0 }
  0xe7   : > { %1060 = vmatmul.mubr.bf16.gmra.mrb[20].mxu0 %v945_v0  ;;  %v1114_v50 = vpop.trf.xlu1  ;;  %v1133_v56 = vpop.trf.xlu0 }
  0xe8   : > { %1198 = vmatmul.mubr.bf16.gmra.mrb[4].mxu1 %v1113_v18 }
  0xe9   : > { %1546 = vmatprep.mubr.msk.bf16.mxu1 %vm964_vm1, %v1130_v45 }
  0xeb   : > { %v1115_v8 = vpop.trf.xlu1 }
  0xef   : > { %v1116_v62 = vpop.trf.xlu1 }
  0xf0   : > { %1206 = vmatmul.mubr.bf16.gmra.mrb[8].mxu1 %v1114_v50 }
  0xf1   : > { %1547 = vmatprep.mubr.msk.bf16.mxu1 %vm964_vm1, %v1131_v13 }
  0xf3   : > { %v1117_v3 = vpop.trf.xlu1 }
  0xf8   : > { %1214 = vmatmul.mubr.bf16.gmra.mrb[12].mxu1 %v1115_v8 }
  0xf9   : > { %1548 = vmatprep.mubr.msk.bf16.mxu1 %vm964_vm1, %v1132_v38 }
 0x100   : > { %1222 = vmatmul.mubr.bf16.gmra.mrb[16].mxu1 %v1116_v62 }
 0x101   : > { %1549 = vmatprep.mubr.msk.bf16.mxu1 %vm964_vm1, %v1133_v56 }
 0x108   : > { %1230 = vmatmul.mubr.bf16.gmra.mrb[20].mxu1 %v1117_v3 }
 0x109   : > { %1647 = shalt.err (!%p1644_p6)
}
 0x10a   : > { %s1648_s13 = scalar_lea.hbm %s3120_s8, 128  ;;  %s1652_s6 = scalar_lea.hbm %s3317_s2, 256 }
 0x10b   : > { %p1649_p7 = scmp.ne.s32.totalorder %s3120_s8, %s1648_s13  ;;  %p1653_p11 = scmp.lt.u32.totalorder %s3120_s8, %s3317_s2 }
 0x10c   : > { %p1654_p12 = scmp.lt.u32.totalorder %s1652_s6, %s1648_s13  ;;  %p1656_p0 = scmp.lt.u32.totalorder %s1648_s13, %s3120_s8 }
 0x10d   : > { %p1650_p9 = pnand %p1649_p7, %p1848_p4 }
 0x10e   : > { %p1655_p13 = por %p1654_p12, %p1653_p11 }
 0x10f   : > { %p1651_p10 = pneg %p1650_p9 }
 0x110   : > { %p1657_p1 = por %p1656_p0, %p1655_p13 }
 0x112   : > { %p1658_p2 = pnand %p1657_p1, %p1651_p10 }
 0x114   : > { %1661 = shalt.err (!%p1658_p2)
}
 0x115   : > { %1559 = dma.vmem_to_hbm [thread:$0]  (%p1848_p4), %s1287_s9, 128, %s3120_s8, %s1263_s10   ;;  %v920_v22 = vld [vmem:[%s2881_s24] sm:$0xff]  ;;  %v921_v12 = vld [vmem:[%s2881_s24 + $0x8] sm:$0xff]  ;;  %v922_v9 = vld [vmem:[%s2881_s24 + $0x10] sm:$0xff] }
 0x116   : > { %v923_v0 = vld [vmem:[%s2881_s24 + $0x18] sm:$0xff]  ;;  %v924_v13 = vld [vmem:[%s2881_s24 + $0x20] sm:$0xff]  ;;  %v925_v38 = vld [vmem:[%s2881_s24 + $0x28] sm:$0xff]  ;;  %s3180_s8 = sand.u32 1, %s1458_s21   ;;  %s1557_s9 = smul.u32 1536, %s1764_s18 }
 0x117   : > { %v926_v4 = vld [vmem:[%s2881_s24 + $0x30] sm:$0xff]  ;;  %v927_v44 = vld [vmem:[%s2881_s24 + $0x38] sm:$0xff]  ;;  %v928_v26 = vld [vmem:[%s2881_s24 + $0x40] sm:$0xff]  ;;  %s1299_s10 = sshll.u32 %s2881_s24, 4  ;;  %s1268_s29 = scalar_lea.sflag [#allocation5], %s3180_s8  ;;  %s3194_s10 = int_to_ptr.vmem [resolvable:$true] %s1299_s10 }
 0x118   : > { %v1092_v48 = vld [vmem:[%s3052_s26] sm:$0xff]  ;;  %v929_v23 = vld [vmem:[%s2881_s24 + $0x48] sm:$0xff]  ;;  %v930_v61 = vld [vmem:[%s2881_s24 + $0x50] sm:$0xff]  ;;  %s3192_s14 = scalar_lea.hbm %s3318_s3, %s1557_s9  ;;  %s1662_s13 = scalar_lea.vmem %s3194_s10, 1536 }
 0x119   : > { %v1093_v24 = vld [vmem:[%s3052_s26 + $0x8] sm:$0xff]  ;;  %v1094_v2 = vld [vmem:[%s3052_s26 + $0x10] sm:$0xff]  ;;  %v931_v52 = vld [vmem:[%s2881_s24 + $0x58] sm:$0xff]  ;;  %p1663_p3 = scmp.ne.s32.totalorder %s3194_s10, %s1662_s13  ;;  %s1777_s30 = smov [#allocation4]  }
 0x11a   : > { %v1095_v34 = vld [vmem:[%s3052_s26 + $0x18] sm:$0xff]  ;;  %s1666_s5 = sshll.u32 %s1777_s30, 4  ;;  %s1667_s5 = int_to_ptr.vmem [resolvable:$false] %s1666_s5 }
 0x11b   : > { %p1664_p5 = pnand %p1663_p3, %p1848_p4  ;;  %s1668_s6 = scalar_lea.vmem %s1667_s5, 3072 }
 0x11c   : > { %p1669_p7 = scmp.lt.s32.totalorder %s3194_s10, %s1667_s5  ;;  %p1670_p9 = scmp.lt.s32.totalorder %s1668_s6, %s1662_s13 }
 0x11d   : > { %p1665_p6 = pneg %p1664_p5 }
 0x11e   : > { %p1671_p10 = por %p1670_p9, %p1669_p7 }
 0x120   : > { %p1672_p11 = pnand %p1671_p10, %p1665_p6 }
 0x192   : > { %v1021_v49 = vpop.f32.mrb[0].mxu0 }
 0x193   : > { %v1068_v46 = vadd.f32 %v1021_v49, %v920_v22  ;;  %v1023_v16 = vpop.f32.mrb[1].mxu0 }
 0x194   : > { %v1024_v7 = vpop.f32.mrb[2].mxu0 }
 0x195   : > { %1080 = vst.msk [vmem:[%s2881_s24] sm:$0xff] %vm297_vm5, %v1068_v46  ;;  %v1069_v42 = vadd.f32 %v1024_v7, %v921_v12  ;;  %v1026_v25 = vpop.f32.mrb[3].mxu0 }
 0x197   : > { %1081 = vst.msk [vmem:[%s2881_s24 + $0x8] sm:$0xff] %vm297_vm5, %v1069_v42 }
 0x19a   : > { %v1029_v21 = vpop.f32.mrb[4].mxu0 }
 0x19b   : > { %v1070_v30 = vadd.f32 %v1029_v21, %v922_v9  ;;  %v1031_v58 = vpop.f32.mrb[5].mxu0 }
 0x19c   : > { %v1032_v18 = vpop.f32.mrb[6].mxu0 }
 0x19d   : > { %1082 = vst.msk [vmem:[%s2881_s24 + $0x10] sm:$0xff] %vm297_vm5, %v1070_v30  ;;  %v1071_v45 = vadd.f32 %v1032_v18, %v923_v0  ;;  %v1034_v50 = vpop.f32.mrb[7].mxu0 }
 0x19f   : > { %1083 = vst.msk [vmem:[%s2881_s24 + $0x18] sm:$0xff] %vm297_vm5, %v1071_v45 }
 0x1a2   : > { %v1037_v8 = vpop.f32.mrb[8].mxu0 }
 0x1a3   : > { %v1072_v62 = vadd.f32 %v1037_v8, %v924_v13  ;;  %v1039_v56 = vpop.f32.mrb[9].mxu0 }
 0x1a4   : > { %v1040_v3 = vpop.f32.mrb[10].mxu0 }
 0x1a5   : > { %1084 = vst.msk [vmem:[%s2881_s24 + $0x20] sm:$0xff] %vm297_vm5, %v1072_v62  ;;  %v1073_v53 = vadd.f32 %v1040_v3, %v925_v38  ;;  %v1042_v6 = vpop.f32.mrb[11].mxu0 }
 0x1a7   : > { %1085 = vst.msk [vmem:[%s2881_s24 + $0x28] sm:$0xff] %vm297_vm5, %v1073_v53 }
 0x1aa   : > { %v1045_v1 = vpop.f32.mrb[12].mxu0 }
 0x1ab   : > { %v1074_v10 = vadd.f32 %v1045_v1, %v926_v4  ;;  %v1047_v51 = vpop.f32.mrb[13].mxu0 }
 0x1ac   : > { %v1048_v39 = vpop.f32.mrb[14].mxu0 }
 0x1ad   : > { %1086 = vst.msk [vmem:[%s2881_s24 + $0x30] sm:$0xff] %vm297_vm5, %v1074_v10  ;;  %v1075_v28 = vadd.f32 %v1048_v39, %v927_v44  ;;  %v1050_v55 = vpop.f32.mrb[15].mxu0 }
 0x1af   : > { %1087 = vst.msk [vmem:[%s2881_s24 + $0x38] sm:$0xff] %vm297_vm5, %v1075_v28 }
 0x1b2   : > { %v1053_v31 = vpop.f32.mrb[16].mxu0 }
 0x1b3   : > { %v1191_v32 = vpop.f32.mrb[0].mxu1  ;;  %v1076_v57 = vadd.f32 %v1053_v31, %v928_v26  ;;  %v1055_v15 = vpop.f32.mrb[17].mxu0 }
 0x1b4   : > { %v1238_v43 = vadd.f32 %v1191_v32, %v1092_v48  ;;  %v1193_v63 = vpop.f32.mrb[1].mxu1  ;;  %v1056_v47 = vpop.f32.mrb[18].mxu0 }
 0x1b5   : > { %1088 = vst.msk [vmem:[%s2881_s24 + $0x40] sm:$0xff] %vm297_vm5, %v1076_v57  ;;  %v1194_v29 = vpop.f32.mrb[2].mxu1  ;;  %v1077_v33 = vadd.f32 %v1056_v47, %v929_v23  ;;  %v1058_v54 = vpop.f32.mrb[19].mxu0 }
 0x1b6   : > { %1250 = vst.msk [vmem:[%s3052_s26] sm:$0xff] %vm297_vm5, %v1238_v43  ;;  %v1239_v14 = vadd.f32 %v1194_v29, %v1093_v24  ;;  %v1196_v41 = vpop.f32.mrb[3].mxu1 }
 0x1b7   : > { %1089 = vst.msk [vmem:[%s2881_s24 + $0x48] sm:$0xff] %vm297_vm5, %v1077_v33 }
 0x1b8   : > { %1251 = vst.msk [vmem:[%s3052_s26 + $0x8] sm:$0xff] %vm297_vm5, %v1239_v14 }
 0x1ba   : > { %v1061_v35 = vpop.f32.mrb[20].mxu0 }
 0x1bb   : > { %v1199_v60 = vpop.f32.mrb[4].mxu1  ;;  %v1078_v37 = vadd.f32 %v1061_v35, %v930_v61  ;;  %v1063_v11 = vpop.f32.mrb[21].mxu0 }
 0x1bc   : > { %v1240_v19 = vadd.f32 %v1199_v60, %v1094_v2  ;;  %v1201_v36 = vpop.f32.mrb[5].mxu1  ;;  %v1064_v27 = vpop.f32.mrb[22].mxu0 }
 0x1bd   : > { %1090 = vst.msk [vmem:[%s2881_s24 + $0x50] sm:$0xff] %vm297_vm5, %v1078_v37  ;;  %v1202_v5 = vpop.f32.mrb[6].mxu1  ;;  %v1079_v40 = vadd.f32 %v1064_v27, %v931_v52  ;;  %v1066_v17 = vpop.f32.mrb[23].mxu0 }
 0x1be   : > { %1252 = vst.msk [vmem:[%s3052_s26 + $0x10] sm:$0xff] %vm297_vm5, %v1240_v19  ;;  %v1241_v20 = vadd.f32 %v1202_v5, %v1095_v34  ;;  %v1204_v59 = vpop.f32.mrb[7].mxu1 }
 0x1bf   : > { %1091 = vst.msk [vmem:[%s2881_s24 + $0x58] sm:$0xff] %vm297_vm5, %v1079_v40 }
 0x1c0   : > { %1253 = vst.msk [vmem:[%s3052_s26 + $0x18] sm:$0xff] %vm297_vm5, %v1241_v20 }
 0x1c1   : > { %1675 = shalt.err (!%p1672_p11)
}
 0x1c2   : > { %s1676_s24 = scalar_lea.hbm %s3192_s14, 1536  ;;  %s1680_s21 = scalar_lea.hbm %s3318_s3, 3072 }
 0x1c3   : > { %p1677_p12 = scmp.ne.s32.totalorder %s3192_s14, %s1676_s24  ;;  %p1681_p1 = scmp.lt.u32.totalorder %s3192_s14, %s3318_s3 }
 0x1c4   : > { %p1682_p2 = scmp.lt.u32.totalorder %s1680_s21, %s1676_s24  ;;  %p1684_p5 = scmp.lt.u32.totalorder %s1676_s24, %s3192_s14 }
 0x1c5   : > { %p1678_p13 = pnand %p1677_p12, %p1848_p4 }
 0x1c6   : > { %p1683_p3 = por %p1682_p2, %p1681_p1 }
 0x1c7   : > { %p1679_p0 = pneg %p1678_p13 }
 0x1c8   : > { %p1685_p6 = por %p1684_p5, %p1683_p3 }
 0x1ca   : > { %p1686_p7 = pnand %p1685_p6, %p1679_p0 }
 0x1cc   : > { %1689 = shalt.err (!%p1686_p7)
}
 0x1cd   : > { %s1778_s13 = smov 128   ;;  %s1779_s5 = smov 8   ;;  %v1096_v22 = vld [vmem:[%s3052_s26 + $0x20] sm:$0xff]  ;;  %v1207_v49 = vpop.f32.mrb[8].mxu1  ;;  %v1097_v12 = vld [vmem:[%s3052_s26 + $0x28] sm:$0xff]  ;;  %v1098_v9 = vld [vmem:[%s3052_s26 + $0x30] sm:$0xff] }
 0x1ce   : > { %1560 = dma.vmem_to_hbm [thread:$0]  (%p1848_p4), %s3194_s10, 1536, %s3192_s14, %s1268_s29, %s1778_s13, %s1778_s13, %s1779_s5   ;;  %v1242_v46 = vadd.f32 %v1207_v49, %v1096_v22  ;;  %v1209_v16 = vpop.f32.mrb[9].mxu1 }
 0x1cf   : > { %v1210_v7 = vpop.f32.mrb[10].mxu1  ;;  %v1099_v0 = vld [vmem:[%s3052_s26 + $0x38] sm:$0xff]  ;;  %v1100_v13 = vld [vmem:[%s3052_s26 + $0x40] sm:$0xff]  ;;  %v1101_v38 = vld [vmem:[%s3052_s26 + $0x48] sm:$0xff]  ;;  %s1315_s10 = sshll.u32 %s3052_s26, 4  ;;  %s3259_s24 = scalar_lea.hbm %s3319_s4, %s1557_s9  ;;  %s3261_s10 = int_to_ptr.vmem [resolvable:$true] %s1315_s10 }
 0x1d0   : > { %1254 = vst.msk [vmem:[%s3052_s26 + $0x20] sm:$0xff] %vm297_vm5, %v1242_v46  ;;  %v1243_v42 = vadd.f32 %v1210_v7, %v1097_v12  ;;  %v1212_v25 = vpop.f32.mrb[11].mxu1  ;;  %v1102_v4 = vld [vmem:[%s3052_s26 + $0x50] sm:$0xff]  ;;  %v1103_v44 = vld [vmem:[%s3052_s26 + $0x58] sm:$0xff]  ;;  %s1690_s7 = scalar_lea.vmem %s3261_s10, 1536  ;;  %s1780_s12 = smov [#allocation6]  }
 0x1d1   : > { %v1215_v21 = vpop.f32.mrb[12].mxu1  ;;  %p1691_p9 = scmp.ne.s32.totalorder %s3261_s10, %s1690_s7  ;;  %s1694_s21 = sshll.u32 %s1780_s12, 4  ;;  %s1695_s21 = int_to_ptr.vmem [resolvable:$false] %s1694_s21 }
 0x1d2   : > { %1255 = vst.msk [vmem:[%s3052_s26 + $0x28] sm:$0xff] %vm297_vm5, %v1243_v42  ;;  %v1244_v30 = vadd.f32 %v1215_v21, %v1098_v9  ;;  %v1217_v58 = vpop.f32.mrb[13].mxu1  ;;  %s1696_s18 = scalar_lea.vmem %s1695_s21, 3072  ;;  %p1697_p12 = scmp.lt.s32.totalorder %s3261_s10, %s1695_s21 }
 0x1d3   : > { %v1218_v18 = vpop.f32.mrb[14].mxu1  ;;  %p1692_p10 = pnand %p1691_p9, %p1848_p4  ;;  %p1698_p13 = scmp.lt.s32.totalorder %s1696_s18, %s1690_s7 }
 0x1d4   : > { %1256 = vst.msk [vmem:[%s3052_s26 + $0x30] sm:$0xff] %vm297_vm5, %v1244_v30  ;;  %v1245_v45 = vadd.f32 %v1218_v18, %v1099_v0  ;;  %v1220_v50 = vpop.f32.mrb[15].mxu1 }
 0x1d5   : > { %v1223_v8 = vpop.f32.mrb[16].mxu1  ;;  %p1693_p11 = pneg %p1692_p10  ;;  %p1699_p0 = por %p1698_p13, %p1697_p12 }
 0x1d6   : > { %1257 = vst.msk [vmem:[%s3052_s26 + $0x38] sm:$0xff] %vm297_vm5, %v1245_v45  ;;  %v1246_v62 = vadd.f32 %v1223_v8, %v1100_v13  ;;  %v1225_v56 = vpop.f32.mrb[17].mxu1 }
 0x1d7   : > { %v1226_v3 = vpop.f32.mrb[18].mxu1  ;;  %p1700_p1 = pnand %p1699_p0, %p1693_p11 }
 0x1d8   : > { %1258 = vst.msk [vmem:[%s3052_s26 + $0x40] sm:$0xff] %vm297_vm5, %v1246_v62  ;;  %v1247_v53 = vadd.f32 %v1226_v3, %v1101_v38  ;;  %v1228_v6 = vpop.f32.mrb[19].mxu1 }
 0x1da   : > { %1259 = vst.msk [vmem:[%s3052_s26 + $0x48] sm:$0xff] %vm297_vm5, %v1247_v53 }
 0x1db   : > { %v1231_v1 = vpop.f32.mrb[20].mxu1 }
 0x1dc   : > { %v1248_v10 = vadd.f32 %v1231_v1, %v1102_v4  ;;  %v1233_v51 = vpop.f32.mrb[21].mxu1 }
 0x1dd   : > { %v1234_v39 = vpop.f32.mrb[22].mxu1 }
 0x1de   : > { %1260 = vst.msk [vmem:[%s3052_s26 + $0x50] sm:$0xff] %vm297_vm5, %v1248_v10  ;;  %v1249_v28 = vadd.f32 %v1234_v39, %v1103_v44  ;;  %v1236_v55 = vpop.f32.mrb[23].mxu1 }
 0x1e0   : > { %1261 = vst.msk [vmem:[%s3052_s26 + $0x58] sm:$0xff] %vm297_vm5, %v1249_v28 }
 0x1e1   : > { %1703 = shalt.err (!%p1700_p1)
}
 0x1e2   : > { %s1704_s26 = scalar_lea.hbm %s3259_s24, 1536  ;;  %s1708_s30 = scalar_lea.hbm %s3319_s4, 3072 }
 0x1e3   : > { %p1705_p2 = scmp.ne.s32.totalorder %s3259_s24, %s1704_s26  ;;  %p1709_p6 = scmp.lt.u32.totalorder %s3259_s24, %s3319_s4 }
 0x1e4   : > { %p1710_p7 = scmp.lt.u32.totalorder %s1708_s30, %s1704_s26  ;;  %p1712_p10 = scmp.lt.u32.totalorder %s1704_s26, %s3259_s24 }
 0x1e5   : > { %p1706_p3 = pnand %p1705_p2, %p1848_p4 }
 0x1e6   : > { %p1711_p9 = por %p1710_p7, %p1709_p6 }
 0x1e7   : > { %p1707_p5 = pneg %p1706_p3 }
 0x1e8   : > { %p1713_p11 = por %p1712_p10, %p1711_p9 }
 0x1ea   : > { %p1714_p12 = pnand %p1713_p11, %p1707_p5 }
 0x1ec   : > { %1717 = shalt.err (!%p1714_p12)
}
 0x1ed   : > { %1561 = dma.vmem_to_hbm [thread:$0]  (%p1848_p4), %s3261_s10, 1536, %s3259_s24, %s1268_s29, %s1778_s13, %s1778_s13, %s1779_s5  }
 0x1ee PF: > { %p1575_p13 = scmp.ge.s32.totalorder %s1772_s20, 2  ;;  %s1330_s7 = sand.u32 1, %s1752_s15  }
 0x1ef   : > { %s1331_s12 = scalar_lea.sflag [#allocation3], %s1330_s7 }
 0x1f0   : > { %p1566_p0 = pnand %p1575_p13, %p1857_p8 }
 0x1f2   : > { %1743 = dma.done.wait (!%p1566_p0), %s1331_s12, 128  }
 0x1f3   : > { %1745 = vsyncadd (!%p1566_p0), %s1331_s12, 4294967168  ;;  %s1339_s25 = sand.u32 1, %s1459_s22  }
 0x1f4   : > { %s1340_s21 = scalar_lea.sflag [#allocation5], %s1339_s25 }
 0x1f5   : > { %1747 = dma.done.wait (!%p1566_p0), %s1340_s21, 3072  }
 0x1f6   : > { %1749 = vsyncadd (!%p1566_p0), %s1340_s21, 4294964224  ;;  %s21_s20 = sadd.s32 1, %s1772_s20   ;;  %s3570_s15 = smov %s1756_s16 }
 0x1f7   : > { %p18_p4 = scmp.ge.s32.totalorder %s21_s20, 4   ;;  %s3571_s16 = smov %s1760_s17 }
 0x1f8   : > { %s3572_s17 = smov %s1863_s28  ;;  %s3573_s18 = smov %s1768_s19 }
 0x1f9   : > { %s3574_s19 = smov %s3576_s23  ;;  %20 = sbr.rel (!%p18_p4) target bundleno = 6 (0x6), region = 102 }
 0x200   :  { %1354 = vsyncpa [#allocation3], 1 }
 0x201   :  { %1356 = vsyncpa [#allocation3 + $0x1], 1 }
 0x202   :  { %1357 = vsyncpa [#allocation5], 1 }
 0x203   :  { %1359 = vsyncpa [#allocation5 + $0x1], 1 }

</bundles_post_ra>
